<compile_context>
chip_gen: v7x
topology: tpu7x:2x2x1
jax: 0.10.0
libtpu: 0.0.40
codegen_flags: <defaults>
</compile_context>

<pallas_src>
import math
from functools import partial

import jax
import jax.numpy as jnp
from jax import lax
from jax.experimental import pallas as pl
from jax.experimental.pallas import tpu as pltpu


def _layernorm(x, gamma, beta, eps=1e-6):
    mu = jnp.mean(x, axis=-1, keepdims=True)
    var = jnp.mean((x - mu) ** 2, axis=-1, keepdims=True)
    return (x - mu) * lax.rsqrt(var + eps) * gamma + beta


# x @ W.T with W stored PyTorch-style (out_features, in_features):
# contract dim 1 of both operands -> no weight transpose in the kernel.
_DN_TRANS_B = (((1,), (1,)), ((), ()))


def _mm(x_f32, w_ref):
    """bf16 MXU matmul with f32 accumulation: x (S, in) @ W(out, in).T."""
    return lax.dot_general(x_f32.astype(jnp.bfloat16), w_ref[...],
                           _DN_TRANS_B, preferred_element_type=jnp.float32)


def decoder_layer_kernel(x_ref, wq_ref, wk_ref, wv_ref, wo_ref,
                         wg_ref, wu_ref, wd_ref,
                         g1_ref, b1_ref, g2_ref, b2_ref,
                         cos_ref, sin_ref,
                         y_ref, kcache_ref, vcache_ref,
                         attn_sc,
                         *, num_heads, head_dim):
    S = x_ref.shape[1]
    x = x_ref[0].astype(jnp.float32)                        # (S, H)

    # ---- input layernorm (f32) ----
    h = _layernorm(x, g1_ref[0], b1_ref[0])

    # ---- QKV projections (bf16 in, f32 accumulate) ----
    # Fold the softmax scale into q before RoPE (RoPE is linear -> exact).
    q = _mm(h, wq_ref) * (1.0 / math.sqrt(head_dim))
    k = _mm(h, wk_ref)
    v = _mm(h, wv_ref)

    cos = cos_ref[...]                                      # (S, H), head-tiled
    sin = sin_ref[...]
    half = head_dim // 2

    def rope_full(t):                                       # t: (S, H) packed heads
        parts = []
        for hidx in range(num_heads):
            lo = hidx * head_dim
            parts.append(-t[:, lo + half:lo + head_dim])
            parts.append(t[:, lo:lo + half])
        return t * cos + jnp.concatenate(parts, axis=-1) * sin

    q = rope_full(q)
    k = rope_full(k)

    # Additive causal bias, built in-kernel (no (S,S) HBM traffic).
    row = lax.broadcasted_iota(jnp.int32, (S, S), 0)
    col = lax.broadcasted_iota(jnp.int32, (S, S), 1)
    bias = jnp.where(col <= row, 0.0, -1e30).astype(jnp.float32)

    # Hoist bf16 casts out of the head loop.
    q_bf = q.astype(jnp.bfloat16)
    k_bf = k.astype(jnp.bfloat16)
    v_bf = v.astype(jnp.bfloat16)

    for hidx in range(num_heads):                           # static, small unroll
        lo = hidx * head_dim
        sl = slice(lo, lo + head_dim)

        # scores = qh @ kh.T  (trans-B dot_general, bf16 in / f32 out)
        scores = lax.dot_general(q_bf[:, sl], k_bf[:, sl], _DN_TRANS_B,
                                 preferred_element_type=jnp.float32)
        scores = scores + bias
        m = jnp.max(scores, axis=-1, keepdims=True)
        e = jnp.exp(scores - m)                             # f32 softmax
        p = e * pl.reciprocal(jnp.sum(e, axis=-1, keepdims=True), approx=True)
        out_h = jnp.dot(p.astype(jnp.bfloat16), v_bf[:, sl],
                        preferred_element_type=jnp.float32)

        # Write into scratch / cache refs: no concatenates, bounded live ranges.
        attn_sc[:, sl] = out_h
        kcache_ref[0, hidx, :, :] = k[:, sl].astype(kcache_ref.dtype)  # post-RoPE
        vcache_ref[0, hidx, :, :] = v[:, sl].astype(vcache_ref.dtype)

    attn = _mm(attn_sc[...], wo_ref)                        # o_proj
    h2 = x + attn                                           # residual 1

    # ---- post-attention layernorm + gated clipped MLP ----
    h3 = _layernorm(h2, g2_ref[0], b2_ref[0])
    gate = _mm(h3, wg_ref)
    up = _mm(h3, wu_ref)
    gate = gate * jax.nn.sigmoid(gate)                      # SiLU (f32)
    gate = jnp.clip(gate, -10.0, 10.0)
    up = jnp.clip(up, -10.0, 10.0)
    hidden = jnp.clip(gate * up, -10.0, 10.0)
    mlp = _mm(hidden, wd_ref)

    y_ref[0] = (h2 + mlp).astype(y_ref.dtype)               # residual 2


def llama_decoder_layer(x, p, cos, sin, *, num_heads, head_dim):
    """One LlamaDecoderLayer forward (attention_mask=None -> causal,
    position_ids=None, past_key_value=None).
    Returns (hidden_states, (key_cache, value_cache)) with caches shaped
    (B, num_heads, S, head_dim)."""
    B, S, H = x.shape
    I = p["wg"].shape[0]

    # Head-tiled RoPE tables so the kernel applies RoPE once over packed (S, H).
    cos_full = jnp.tile(cos, (1, num_heads))                # (S, H)
    sin_full = jnp.tile(sin, (1, num_heads))

    def full(shape):
        return pl.BlockSpec(shape, lambda b, _n=len(shape): (0,) * _n)

    kernel = partial(decoder_layer_kernel, num_heads=num_heads, head_dim=head_dim)
    y, kc, vc = pl.pallas_call(
        kernel,
        out_shape=(jax.ShapeDtypeStruct((B, S, H), x.dtype),
                   jax.ShapeDtypeStruct((B, num_heads, S, head_dim), x.dtype),
                   jax.ShapeDtypeStruct((B, num_heads, S, head_dim), x.dtype)),
        grid=(B,),
        in_specs=[
            pl.BlockSpec((1, S, H), lambda b: (b, 0, 0)),
            full((H, H)), full((H, H)), full((H, H)), full((H, H)),   # wq wk wv wo
            full((I, H)), full((I, H)), full((H, I)),                 # wg wu wd
            full((1, H)), full((1, H)), full((1, H)), full((1, H)),   # LN params
            full((S, H)), full((S, H)),                               # cos, sin
        ],
        out_specs=[
            pl.BlockSpec((1, S, H), lambda b: (b, 0, 0)),
            pl.BlockSpec((1, num_heads, S, head_dim), lambda b: (b, 0, 0, 0)),
            pl.BlockSpec((1, num_heads, S, head_dim), lambda b: (b, 0, 0, 0)),
        ],
        scratch_shapes=[pltpu.VMEM((S, H), jnp.float32)],
        compiler_params=pltpu.CompilerParams(
            dimension_semantics=("parallel",),
            vmem_limit_bytes=32 * 1024 * 1024),
    )(x, p["wq"], p["wk"], p["wv"], p["wo"], p["wg"], p["wu"], p["wd"],
      p["g1"], p["b1"], p["g2"], p["b2"], cos_full, sin_full)
    return y, (kc, vc)


def rope_tables(seq_len, head_dim, rope_theta):
    pos = jnp.arange(seq_len, dtype=jnp.float32)
    inv_freq = 1.0 / (rope_theta ** (jnp.arange(0, head_dim, 2, dtype=jnp.float32)
                                     / head_dim))
    freqs = pos[:, None] * inv_freq[None, :]
    emb = jnp.concatenate([freqs, freqs], axis=-1)
    return jnp.cos(emb), jnp.sin(emb)


def xavier_uniform(key, out_f, in_f):
    bound = math.sqrt(6.0 / (in_f + out_f))
    return jax.random.uniform(key, (out_f, in_f), jnp.float32, -bound, bound)


def make_layer_params(key, hidden, intermediate):
    keys = jax.random.split(key, 7)
    bf16 = lambda w: w.astype(jnp.bfloat16)   # bf16 weights: MXU rate + half DMA bytes
    return {
        "wq": bf16(xavier_uniform(keys[0], hidden, hidden)),
        "wk": bf16(xavier_uniform(keys[1], hidden, hidden)),
        "wv": bf16(xavier_uniform(keys[2], hidden, hidden)),
        "wo": bf16(xavier_uniform(keys[3], hidden, hidden)),
        "wg": bf16(xavier_uniform(keys[4], intermediate, hidden)),
        "wu": bf16(xavier_uniform(keys[5], intermediate, hidden)),
        "wd": bf16(xavier_uniform(keys[6], hidden, intermediate)),
        "g1": jnp.ones((1, hidden), jnp.float32),
        "b1": jnp.zeros((1, hidden), jnp.float32),
        "g2": jnp.ones((1, hidden), jnp.float32),
        "b2": jnp.zeros((1, hidden), jnp.float32),
    }


if __name__ == "__main__":
    # Small config consistent with the module.
    batch = 2
    seq = 8
    hidden_size = 32
    num_heads = 4
    head_dim = hidden_size // num_heads
    intermediate_size = 64
    num_decoder_layers = 2
    rope_theta = 10000.0

    key = jax.random.PRNGKey(0)
    key, kx = jax.random.split(key)
    hidden_states = jax.random.normal(kx, (batch, seq, hidden_size), jnp.float32)

    cos, sin = rope_tables(seq, head_dim, rope_theta)

    layer_keys = jax.random.split(key, num_decoder_layers)
    layers = [make_layer_params(k, hidden_size, intermediate_size)
              for k in layer_keys]

    x = hidden_states
    presents = []
    for p in layers:
        x, kv = llama_decoder_layer(x, p, cos, sin,
                                    num_heads=num_heads, head_dim=head_dim)
        presents.append(kv)

    jax.block_until_ready(x)
    for kc, vc in presents:
        jax.block_until_ready(kc)
        jax.block_until_ready(vc)

    assert x.shape == (batch, seq, hidden_size)
    assert presents[0][0].shape == (batch, num_heads, seq, head_dim)
    assert presents[0][1].shape == (batch, num_heads, seq, head_dim)
    assert bool(jnp.all(jnp.isfinite(x)))
    print("KERNEL_OK")
</pallas_src>

<mosaic_0001>
module attributes {stable_mosaic.version = 11 : i64} {
  func.func @decoder_layer_kernel(%arg0: i32, %arg1: memref<1x8x32xf32, #tpu.memory_space<vmem>>, %arg2: memref<32x32xbf16, #tpu.memory_space<vmem>>, %arg3: memref<32x32xbf16, #tpu.memory_space<vmem>>, %arg4: memref<32x32xbf16, #tpu.memory_space<vmem>>, %arg5: memref<32x32xbf16, #tpu.memory_space<vmem>>, %arg6: memref<64x32xbf16, #tpu.memory_space<vmem>>, %arg7: memref<64x32xbf16, #tpu.memory_space<vmem>>, %arg8: memref<32x64xbf16, #tpu.memory_space<vmem>>, %arg9: memref<1x32xf32, #tpu.memory_space<vmem>>, %arg10: memref<1x32xf32, #tpu.memory_space<vmem>>, %arg11: memref<1x32xf32, #tpu.memory_space<vmem>>, %arg12: memref<1x32xf32, #tpu.memory_space<vmem>>, %arg13: memref<8x32xf32, #tpu.memory_space<vmem>>, %arg14: memref<8x32xf32, #tpu.memory_space<vmem>>, %arg15: memref<1x8x32xf32, #tpu.memory_space<vmem>>, %arg16: memref<1x4x8x8xf32, #tpu.memory_space<vmem>>, %arg17: memref<1x4x8x8xf32, #tpu.memory_space<vmem>>, %arg18: memref<8x32xf32, #tpu.memory_space<vmem>>) attributes {dimension_semantics = [#tpu.dimension_semantics<parallel>], iteration_bounds = array<i64: 2>, scalar_prefetch = 0 : i64, scratch_operands = 1 : i64, tpu.core_type = #tpu.core_type<tc>, window_params = [{transform_indices = @transform_0, window_bounds = array<i64: 1, 8, 32>}, {pipeline_mode = #tpu.pipeline_mode<synchronous>, transform_indices = @transform_1, window_bounds = array<i64: 32, 32>}, {pipeline_mode = #tpu.pipeline_mode<synchronous>, transform_indices = @transform_2, window_bounds = array<i64: 32, 32>}, {pipeline_mode = #tpu.pipeline_mode<synchronous>, transform_indices = @transform_3, window_bounds = array<i64: 32, 32>}, {pipeline_mode = #tpu.pipeline_mode<synchronous>, transform_indices = @transform_4, window_bounds = array<i64: 32, 32>}, {pipeline_mode = #tpu.pipeline_mode<synchronous>, transform_indices = @transform_5, window_bounds = array<i64: 64, 32>}, {pipeline_mode = #tpu.pipeline_mode<synchronous>, transform_indices = @transform_6, window_bounds = array<i64: 64, 32>}, {pipeline_mode = #tpu.pipeline_mode<synchronous>, transform_indices = @transform_7, window_bounds = array<i64: 32, 64>}, {pipeline_mode = #tpu.pipeline_mode<synchronous>, transform_indices = @transform_8, window_bounds = array<i64: 1, 32>}, {pipeline_mode = #tpu.pipeline_mode<synchronous>, transform_indices = @transform_9, window_bounds = array<i64: 1, 32>}, {pipeline_mode = #tpu.pipeline_mode<synchronous>, transform_indices = @transform_10, window_bounds = array<i64: 1, 32>}, {pipeline_mode = #tpu.pipeline_mode<synchronous>, transform_indices = @transform_11, window_bounds = array<i64: 1, 32>}, {pipeline_mode = #tpu.pipeline_mode<synchronous>, transform_indices = @transform_12, window_bounds = array<i64: 8, 32>}, {pipeline_mode = #tpu.pipeline_mode<synchronous>, transform_indices = @transform_13, window_bounds = array<i64: 8, 32>}, {transform_indices = @transform_14, window_bounds = array<i64: 1, 8, 32>}, {transform_indices = @transform_15, window_bounds = array<i64: 1, 4, 8, 8>}, {transform_indices = @transform_16, window_bounds = array<i64: 1, 4, 8, 8>}]} {
    %c0 = arith.constant 0 : index
    %c0_0 = arith.constant 0 : index
    %c0_1 = arith.constant 0 : index
    %0 = vector.load %arg1[%c0, %c0_0, %c0_1] : memref<1x8x32xf32, #tpu.memory_space<vmem>>, vector<1x8x32xf32>
    %1 = vector.shape_cast %0 : vector<1x8x32xf32> to vector<8x32xf32>
    %c0_2 = arith.constant 0 : index
    %c0_3 = arith.constant 0 : index
    %2 = vector.load %arg9[%c0_2, %c0_3] : memref<1x32xf32, #tpu.memory_space<vmem>>, vector<1x32xf32>
    %3 = vector.shape_cast %2 : vector<1x32xf32> to vector<32xf32>
    %c0_4 = arith.constant 0 : index
    %c0_5 = arith.constant 0 : index
    %4 = vector.load %arg10[%c0_4, %c0_5] : memref<1x32xf32, #tpu.memory_space<vmem>>, vector<1x32xf32>
    %5 = vector.shape_cast %4 : vector<1x32xf32> to vector<32xf32>
    %cst = arith.constant dense<0.000000e+00> : vector<8xf32>
    %6 = vector.multi_reduction <add>, %1, %cst [1] : vector<8x32xf32> to vector<8xf32>
    %7 = vector.shape_cast %6 : vector<8xf32> to vector<8x1xf32>
    %cst_6 = arith.constant 3.200000e+01 : f32
    %8 = vector.broadcast %cst_6 : f32 to vector<8x1xf32>
    %9 = arith.divf %7, %8 : vector<8x1xf32>
    %10 = vector.broadcast %9 : vector<8x1xf32> to vector<8x32xf32>
    %11 = arith.subf %1, %10 : vector<8x32xf32>
    %12 = arith.mulf %11, %11 : vector<8x32xf32>
    %cst_7 = arith.constant dense<0.000000e+00> : vector<8xf32>
    %13 = vector.multi_reduction <add>, %12, %cst_7 [1] : vector<8x32xf32> to vector<8xf32>
    %14 = vector.shape_cast %13 : vector<8xf32> to vector<8x1xf32>
    %cst_8 = arith.constant 3.200000e+01 : f32
    %15 = vector.broadcast %cst_8 : f32 to vector<8x1xf32>
    %16 = arith.divf %14, %15 : vector<8x1xf32>
    %17 = vector.broadcast %9 : vector<8x1xf32> to vector<8x32xf32>
    %18 = arith.subf %1, %17 : vector<8x32xf32>
    %cst_9 = arith.constant 9.99999997E-7 : f32
    %19 = vector.broadcast %cst_9 : f32 to vector<8x1xf32>
    %20 = arith.addf %16, %19 : vector<8x1xf32>
    %21 = math.rsqrt %20 : vector<8x1xf32>
    %22 = vector.broadcast %21 : vector<8x1xf32> to vector<8x32xf32>
    %23 = arith.mulf %18, %22 : vector<8x32xf32>
    %24 = vector.shape_cast %3 : vector<32xf32> to vector<1x32xf32>
    %25 = vector.broadcast %24 : vector<1x32xf32> to vector<8x32xf32>
    %26 = arith.mulf %23, %25 : vector<8x32xf32>
    %27 = vector.shape_cast %5 : vector<32xf32> to vector<1x32xf32>
    %28 = vector.broadcast %27 : vector<1x32xf32> to vector<8x32xf32>
    %29 = arith.addf %26, %28 : vector<8x32xf32>
    %30 = arith.truncf %29 : vector<8x32xf32> to vector<8x32xbf16>
    %c0_10 = arith.constant 0 : index
    %c0_11 = arith.constant 0 : index
    %31 = vector.load %arg2[%c0_10, %c0_11] : memref<32x32xbf16, #tpu.memory_space<vmem>>, vector<32x32xbf16>
    %cst_12 = arith.constant dense<0.000000e+00> : vector<8x32xf32>
    %32 = tpu.matmul %30, %31, %cst_12 {dimension_numbers = #tpu.dot_dimension_numbers<[1], [1], [0], [0], [0, 0, 1, 0], [], []>} : vector<8x32xbf16>, vector<32x32xbf16>, vector<8x32xf32> -> vector<8x32xf32>
    %cst_13 = arith.constant 0.353553385 : f32
    %33 = vector.broadcast %cst_13 : f32 to vector<8x32xf32>
    %34 = arith.mulf %32, %33 : vector<8x32xf32>
    %35 = arith.truncf %29 : vector<8x32xf32> to vector<8x32xbf16>
    %c0_14 = arith.constant 0 : index
    %c0_15 = arith.constant 0 : index
    %36 = vector.load %arg3[%c0_14, %c0_15] : memref<32x32xbf16, #tpu.memory_space<vmem>>, vector<32x32xbf16>
    %cst_16 = arith.constant dense<0.000000e+00> : vector<8x32xf32>
    %37 = tpu.matmul %35, %36, %cst_16 {dimension_numbers = #tpu.dot_dimension_numbers<[1], [1], [0], [0], [0, 0, 1, 0], [], []>} : vector<8x32xbf16>, vector<32x32xbf16>, vector<8x32xf32> -> vector<8x32xf32>
    %38 = arith.truncf %29 : vector<8x32xf32> to vector<8x32xbf16>
    %c0_17 = arith.constant 0 : index
    %c0_18 = arith.constant 0 : index
    %39 = vector.load %arg4[%c0_17, %c0_18] : memref<32x32xbf16, #tpu.memory_space<vmem>>, vector<32x32xbf16>
    %cst_19 = arith.constant dense<0.000000e+00> : vector<8x32xf32>
    %40 = tpu.matmul %38, %39, %cst_19 {dimension_numbers = #tpu.dot_dimension_numbers<[1], [1], [0], [0], [0, 0, 1, 0], [], []>} : vector<8x32xbf16>, vector<32x32xbf16>, vector<8x32xf32> -> vector<8x32xf32>
    %c0_20 = arith.constant 0 : index
    %c0_21 = arith.constant 0 : index
    %41 = vector.load %arg13[%c0_20, %c0_21] : memref<8x32xf32, #tpu.memory_space<vmem>>, vector<8x32xf32>
    %c0_22 = arith.constant 0 : index
    %c0_23 = arith.constant 0 : index
    %42 = vector.load %arg14[%c0_22, %c0_23] : memref<8x32xf32, #tpu.memory_space<vmem>>, vector<8x32xf32>
    %43 = vector.extract_strided_slice %34 {offsets = [0, 4], sizes = [8, 4], strides = [1, 1]} : vector<8x32xf32> to vector<8x4xf32>
    %cst_24 = arith.constant 0.000000e+00 : f32
    %44 = vector.broadcast %cst_24 : f32 to vector<8x4xf32>
    %45 = arith.subf %44, %43 : vector<8x4xf32>
    %46 = vector.extract_strided_slice %34 {offsets = [0, 0], sizes = [8, 4], strides = [1, 1]} : vector<8x32xf32> to vector<8x4xf32>
    %47 = vector.extract_strided_slice %34 {offsets = [0, 12], sizes = [8, 4], strides = [1, 1]} : vector<8x32xf32> to vector<8x4xf32>
    %cst_25 = arith.constant 0.000000e+00 : f32
    %48 = vector.broadcast %cst_25 : f32 to vector<8x4xf32>
    %49 = arith.subf %48, %47 : vector<8x4xf32>
    %50 = vector.extract_strided_slice %34 {offsets = [0, 8], sizes = [8, 4], strides = [1, 1]} : vector<8x32xf32> to vector<8x4xf32>
    %51 = vector.extract_strided_slice %34 {offsets = [0, 20], sizes = [8, 4], strides = [1, 1]} : vector<8x32xf32> to vector<8x4xf32>
    %cst_26 = arith.constant 0.000000e+00 : f32
    %52 = vector.broadcast %cst_26 : f32 to vector<8x4xf32>
    %53 = arith.subf %52, %51 : vector<8x4xf32>
    %54 = vector.extract_strided_slice %34 {offsets = [0, 16], sizes = [8, 4], strides = [1, 1]} : vector<8x32xf32> to vector<8x4xf32>
    %55 = vector.extract_strided_slice %34 {offsets = [0, 28], sizes = [8, 4], strides = [1, 1]} : vector<8x32xf32> to vector<8x4xf32>
    %cst_27 = arith.constant 0.000000e+00 : f32
    %56 = vector.broadcast %cst_27 : f32 to vector<8x4xf32>
    %57 = arith.subf %56, %55 : vector<8x4xf32>
    %58 = vector.extract_strided_slice %34 {offsets = [0, 24], sizes = [8, 4], strides = [1, 1]} : vector<8x32xf32> to vector<8x4xf32>
    %59 = arith.mulf %34, %41 : vector<8x32xf32>
    %60 = tpu.concatenate %45, %46, %49, %50, %53, %54, %57, %58 in 1 : vector<8x4xf32>, vector<8x4xf32>, vector<8x4xf32>, vector<8x4xf32>, vector<8x4xf32>, vector<8x4xf32>, vector<8x4xf32>, vector<8x4xf32> -> vector<8x32xf32>
    %61 = arith.mulf %60, %42 : vector<8x32xf32>
    %62 = arith.addf %59, %61 : vector<8x32xf32>
    %63 = vector.extract_strided_slice %37 {offsets = [0, 4], sizes = [8, 4], strides = [1, 1]} : vector<8x32xf32> to vector<8x4xf32>
    %cst_28 = arith.constant 0.000000e+00 : f32
    %64 = vector.broadcast %cst_28 : f32 to vector<8x4xf32>
    %65 = arith.subf %64, %63 : vector<8x4xf32>
    %66 = vector.extract_strided_slice %37 {offsets = [0, 0], sizes = [8, 4], strides = [1, 1]} : vector<8x32xf32> to vector<8x4xf32>
    %67 = vector.extract_strided_slice %37 {offsets = [0, 12], sizes = [8, 4], strides = [1, 1]} : vector<8x32xf32> to vector<8x4xf32>
    %cst_29 = arith.constant 0.000000e+00 : f32
    %68 = vector.broadcast %cst_29 : f32 to vector<8x4xf32>
    %69 = arith.subf %68, %67 : vector<8x4xf32>
    %70 = vector.extract_strided_slice %37 {offsets = [0, 8], sizes = [8, 4], strides = [1, 1]} : vector<8x32xf32> to vector<8x4xf32>
    %71 = vector.extract_strided_slice %37 {offsets = [0, 20], sizes = [8, 4], strides = [1, 1]} : vector<8x32xf32> to vector<8x4xf32>
    %cst_30 = arith.constant 0.000000e+00 : f32
    %72 = vector.broadcast %cst_30 : f32 to vector<8x4xf32>
    %73 = arith.subf %72, %71 : vector<8x4xf32>
    %74 = vector.extract_strided_slice %37 {offsets = [0, 16], sizes = [8, 4], strides = [1, 1]} : vector<8x32xf32> to vector<8x4xf32>
    %75 = vector.extract_strided_slice %37 {offsets = [0, 28], sizes = [8, 4], strides = [1, 1]} : vector<8x32xf32> to vector<8x4xf32>
    %cst_31 = arith.constant 0.000000e+00 : f32
    %76 = vector.broadcast %cst_31 : f32 to vector<8x4xf32>
    %77 = arith.subf %76, %75 : vector<8x4xf32>
    %78 = vector.extract_strided_slice %37 {offsets = [0, 24], sizes = [8, 4], strides = [1, 1]} : vector<8x32xf32> to vector<8x4xf32>
    %79 = arith.mulf %37, %41 : vector<8x32xf32>
    %80 = tpu.concatenate %65, %66, %69, %70, %73, %74, %77, %78 in 1 : vector<8x4xf32>, vector<8x4xf32>, vector<8x4xf32>, vector<8x4xf32>, vector<8x4xf32>, vector<8x4xf32>, vector<8x4xf32>, vector<8x4xf32> -> vector<8x32xf32>
    %81 = arith.mulf %80, %42 : vector<8x32xf32>
    %82 = arith.addf %79, %81 : vector<8x32xf32>
    %83 = tpu.iota {dimensions = array<i32: 0>} : vector<8x8xi32>
    %84 = tpu.iota {dimensions = array<i32: 1>} : vector<8x8xi32>
    %85 = arith.cmpi sle, %84, %83 : vector<8x8xi32>
    %cst_32 = arith.constant 0.000000e+00 : f32
    %cst_33 = arith.constant -1.000000e+30 : f32
    %86 = vector.broadcast %cst_32 : f32 to vector<8x8xf32>
    %87 = vector.broadcast %cst_33 : f32 to vector<8x8xf32>
    %88 = arith.select %85, %86, %87 : vector<8x8xi1>, vector<8x8xf32>
    %89 = arith.truncf %62 : vector<8x32xf32> to vector<8x32xbf16>
    %90 = arith.truncf %82 : vector<8x32xf32> to vector<8x32xbf16>
    %91 = arith.truncf %40 : vector<8x32xf32> to vector<8x32xbf16>
    %92 = vector.extract_strided_slice %89 {offsets = [0, 0], sizes = [8, 8], strides = [1, 1]} : vector<8x32xbf16> to vector<8x8xbf16>
    %93 = vector.extract_strided_slice %90 {offsets = [0, 0], sizes = [8, 8], strides = [1, 1]} : vector<8x32xbf16> to vector<8x8xbf16>
    %cst_34 = arith.constant dense<0.000000e+00> : vector<8x8xf32>
    %94 = tpu.matmul %92, %93, %cst_34 {dimension_numbers = #tpu.dot_dimension_numbers<[1], [1], [0], [0], [0, 0, 1, 0], [], []>} : vector<8x8xbf16>, vector<8x8xbf16>, vector<8x8xf32> -> vector<8x8xf32>
    %95 = arith.addf %94, %88 : vector<8x8xf32>
    %cst_35 = arith.constant dense<0xFF800000> : vector<8xf32>
    %96 = vector.multi_reduction <maximumf>, %95, %cst_35 [1] : vector<8x8xf32> to vector<8xf32>
    %97 = vector.shape_cast %96 : vector<8xf32> to vector<8x1xf32>
    %98 = vector.broadcast %97 : vector<8x1xf32> to vector<8x8xf32>
    %99 = arith.subf %95, %98 : vector<8x8xf32>
    %100 = math.exp %99 : vector<8x8xf32>
    %cst_36 = arith.constant dense<0.000000e+00> : vector<8xf32>
    %101 = vector.multi_reduction <add>, %100, %cst_36 [1] : vector<8x8xf32> to vector<8xf32>
    %102 = vector.shape_cast %101 : vector<8xf32> to vector<8x1xf32>
    %103 = tpu.reciprocal %102 {approx = true} : vector<8x1xf32> -> vector<8x1xf32>
    %104 = vector.broadcast %103 : vector<8x1xf32> to vector<8x8xf32>
    %105 = arith.mulf %100, %104 : vector<8x8xf32>
    %106 = arith.truncf %105 : vector<8x8xf32> to vector<8x8xbf16>
    %107 = vector.extract_strided_slice %91 {offsets = [0, 0], sizes = [8, 8], strides = [1, 1]} : vector<8x32xbf16> to vector<8x8xbf16>
    %cst_37 = arith.constant dense<0.000000e+00> : vector<8x8xf32>
    %108 = tpu.matmul %106, %107, %cst_37 {dimension_numbers = #tpu.dot_dimension_numbers<[1], [0], [0], [1], [0, 0, 1, 1], [], []>} : vector<8x8xbf16>, vector<8x8xbf16>, vector<8x8xf32> -> vector<8x8xf32>
    %c0_38 = arith.constant 0 : index
    %c0_39 = arith.constant 0 : index
    %109 = vector.load %arg18[%c0_38, %c0_39] : memref<8x32xf32, #tpu.memory_space<vmem>>, vector<8x8xf32>
    tpu.vector_store %arg18[%c0_38, %c0_39], %108 {strides = array<i32>} : memref<8x32xf32, #tpu.memory_space<vmem>>, vector<8x8xf32>,
    %110 = vector.extract_strided_slice %82 {offsets = [0, 0], sizes = [8, 8], strides = [1, 1]} : vector<8x32xf32> to vector<8x8xf32>
    %c0_40 = arith.constant 0 : index
    %c0_41 = arith.constant 0 : index
    %c0_42 = arith.constant 0 : index
    %c0_43 = arith.constant 0 : index
    %111 = vector.load %arg16[%c0_40, %c0_41, %c0_42, %c0_43] : memref<1x4x8x8xf32, #tpu.memory_space<vmem>>, vector<1x1x8x8xf32>
    %112 = vector.shape_cast %111 : vector<1x1x8x8xf32> to vector<8x8xf32>
    %113 = vector.shape_cast %110 : vector<8x8xf32> to vector<1x1x8x8xf32>
    tpu.vector_store %arg16[%c0_40, %c0_41, %c0_42, %c0_43], %113 {strides = array<i32>} : memref<1x4x8x8xf32, #tpu.memory_space<vmem>>, vector<1x1x8x8xf32>,
    %114 = vector.extract_strided_slice %40 {offsets = [0, 0], sizes = [8, 8], strides = [1, 1]} : vector<8x32xf32> to vector<8x8xf32>
    %c0_44 = arith.constant 0 : index
    %c0_45 = arith.constant 0 : index
    %c0_46 = arith.constant 0 : index
    %c0_47 = arith.constant 0 : index
    %115 = vector.load %arg17[%c0_44, %c0_45, %c0_46, %c0_47] : memref<1x4x8x8xf32, #tpu.memory_space<vmem>>, vector<1x1x8x8xf32>
    %116 = vector.shape_cast %115 : vector<1x1x8x8xf32> to vector<8x8xf32>
    %117 = vector.shape_cast %114 : vector<8x8xf32> to vector<1x1x8x8xf32>
    tpu.vector_store %arg17[%c0_44, %c0_45, %c0_46, %c0_47], %117 {strides = array<i32>} : memref<1x4x8x8xf32, #tpu.memory_space<vmem>>, vector<1x1x8x8xf32>,
    %118 = vector.extract_strided_slice %89 {offsets = [0, 8], sizes = [8, 8], strides = [1, 1]} : vector<8x32xbf16> to vector<8x8xbf16>
    %119 = vector.extract_strided_slice %90 {offsets = [0, 8], sizes = [8, 8], strides = [1, 1]} : vector<8x32xbf16> to vector<8x8xbf16>
    %cst_48 = arith.constant dense<0.000000e+00> : vector<8x8xf32>
    %120 = tpu.matmul %118, %119, %cst_48 {dimension_numbers = #tpu.dot_dimension_numbers<[1], [1], [0], [0], [0, 0, 1, 0], [], []>} : vector<8x8xbf16>, vector<8x8xbf16>, vector<8x8xf32> -> vector<8x8xf32>
    %121 = arith.addf %120, %88 : vector<8x8xf32>
    %cst_49 = arith.constant dense<0xFF800000> : vector<8xf32>
    %122 = vector.multi_reduction <maximumf>, %121, %cst_49 [1] : vector<8x8xf32> to vector<8xf32>
    %123 = vector.shape_cast %122 : vector<8xf32> to vector<8x1xf32>
    %124 = vector.broadcast %123 : vector<8x1xf32> to vector<8x8xf32>
    %125 = arith.subf %121, %124 : vector<8x8xf32>
    %126 = math.exp %125 : vector<8x8xf32>
    %cst_50 = arith.constant dense<0.000000e+00> : vector<8xf32>
    %127 = vector.multi_reduction <add>, %126, %cst_50 [1] : vector<8x8xf32> to vector<8xf32>
    %128 = vector.shape_cast %127 : vector<8xf32> to vector<8x1xf32>
    %129 = tpu.reciprocal %128 {approx = true} : vector<8x1xf32> -> vector<8x1xf32>
    %130 = vector.broadcast %129 : vector<8x1xf32> to vector<8x8xf32>
    %131 = arith.mulf %126, %130 : vector<8x8xf32>
    %132 = arith.truncf %131 : vector<8x8xf32> to vector<8x8xbf16>
    %133 = vector.extract_strided_slice %91 {offsets = [0, 8], sizes = [8, 8], strides = [1, 1]} : vector<8x32xbf16> to vector<8x8xbf16>
    %cst_51 = arith.constant dense<0.000000e+00> : vector<8x8xf32>
    %134 = tpu.matmul %132, %133, %cst_51 {dimension_numbers = #tpu.dot_dimension_numbers<[1], [0], [0], [1], [0, 0, 1, 1], [], []>} : vector<8x8xbf16>, vector<8x8xbf16>, vector<8x8xf32> -> vector<8x8xf32>
    %c0_52 = arith.constant 0 : index
    %c8 = arith.constant 8 : index
    %135 = vector.load %arg18[%c0_52, %c8] : memref<8x32xf32, #tpu.memory_space<vmem>>, vector<8x8xf32>
    tpu.vector_store %arg18[%c0_52, %c8], %134 {strides = array<i32>} : memref<8x32xf32, #tpu.memory_space<vmem>>, vector<8x8xf32>,
    %136 = vector.extract_strided_slice %82 {offsets = [0, 8], sizes = [8, 8], strides = [1, 1]} : vector<8x32xf32> to vector<8x8xf32>
    %c0_53 = arith.constant 0 : index
    %c1 = arith.constant 1 : index
    %c0_54 = arith.constant 0 : index
    %c0_55 = arith.constant 0 : index
    %137 = vector.load %arg16[%c0_53, %c1, %c0_54, %c0_55] : memref<1x4x8x8xf32, #tpu.memory_space<vmem>>, vector<1x1x8x8xf32>
    %138 = vector.shape_cast %137 : vector<1x1x8x8xf32> to vector<8x8xf32>
    %139 = vector.shape_cast %136 : vector<8x8xf32> to vector<1x1x8x8xf32>
    tpu.vector_store %arg16[%c0_53, %c1, %c0_54, %c0_55], %139 {strides = array<i32>} : memref<1x4x8x8xf32, #tpu.memory_space<vmem>>, vector<1x1x8x8xf32>,
    %140 = vector.extract_strided_slice %40 {offsets = [0, 8], sizes = [8, 8], strides = [1, 1]} : vector<8x32xf32> to vector<8x8xf32>
    %c0_56 = arith.constant 0 : index
    %c1_57 = arith.constant 1 : index
    %c0_58 = arith.constant 0 : index
    %c0_59 = arith.constant 0 : index
    %141 = vector.load %arg17[%c0_56, %c1_57, %c0_58, %c0_59] : memref<1x4x8x8xf32, #tpu.memory_space<vmem>>, vector<1x1x8x8xf32>
    %142 = vector.shape_cast %141 : vector<1x1x8x8xf32> to vector<8x8xf32>
    %143 = vector.shape_cast %140 : vector<8x8xf32> to vector<1x1x8x8xf32>
    tpu.vector_store %arg17[%c0_56, %c1_57, %c0_58, %c0_59], %143 {strides = array<i32>} : memref<1x4x8x8xf32, #tpu.memory_space<vmem>>, vector<1x1x8x8xf32>,
    %144 = vector.extract_strided_slice %89 {offsets = [0, 16], sizes = [8, 8], strides = [1, 1]} : vector<8x32xbf16> to vector<8x8xbf16>
    %145 = vector.extract_strided_slice %90 {offsets = [0, 16], sizes = [8, 8], strides = [1, 1]} : vector<8x32xbf16> to vector<8x8xbf16>
    %cst_60 = arith.constant dense<0.000000e+00> : vector<8x8xf32>
    %146 = tpu.matmul %144, %145, %cst_60 {dimension_numbers = #tpu.dot_dimension_numbers<[1], [1], [0], [0], [0, 0, 1, 0], [], []>} : vector<8x8xbf16>, vector<8x8xbf16>, vector<8x8xf32> -> vector<8x8xf32>
    %147 = arith.addf %146, %88 : vector<8x8xf32>
    %cst_61 = arith.constant dense<0xFF800000> : vector<8xf32>
    %148 = vector.multi_reduction <maximumf>, %147, %cst_61 [1] : vector<8x8xf32> to vector<8xf32>
    %149 = vector.shape_cast %148 : vector<8xf32> to vector<8x1xf32>
    %150 = vector.broadcast %149 : vector<8x1xf32> to vector<8x8xf32>
    %151 = arith.subf %147, %150 : vector<8x8xf32>
    %152 = math.exp %151 : vector<8x8xf32>
    %cst_62 = arith.constant dense<0.000000e+00> : vector<8xf32>
    %153 = vector.multi_reduction <add>, %152, %cst_62 [1] : vector<8x8xf32> to vector<8xf32>
    %154 = vector.shape_cast %153 : vector<8xf32> to vector<8x1xf32>
    %155 = tpu.reciprocal %154 {approx = true} : vector<8x1xf32> -> vector<8x1xf32>
    %156 = vector.broadcast %155 : vector<8x1xf32> to vector<8x8xf32>
    %157 = arith.mulf %152, %156 : vector<8x8xf32>
    %158 = arith.truncf %157 : vector<8x8xf32> to vector<8x8xbf16>
    %159 = vector.extract_strided_slice %91 {offsets = [0, 16], sizes = [8, 8], strides = [1, 1]} : vector<8x32xbf16> to vector<8x8xbf16>
    %cst_63 = arith.constant dense<0.000000e+00> : vector<8x8xf32>
    %160 = tpu.matmul %158, %159, %cst_63 {dimension_numbers = #tpu.dot_dimension_numbers<[1], [0], [0], [1], [0, 0, 1, 1], [], []>} : vector<8x8xbf16>, vector<8x8xbf16>, vector<8x8xf32> -> vector<8x8xf32>
    %c0_64 = arith.constant 0 : index
    %c16 = arith.constant 16 : index
    %161 = vector.load %arg18[%c0_64, %c16] : memref<8x32xf32, #tpu.memory_space<vmem>>, vector<8x8xf32>
    tpu.vector_store %arg18[%c0_64, %c16], %160 {strides = array<i32>} : memref<8x32xf32, #tpu.memory_space<vmem>>, vector<8x8xf32>,
    %162 = vector.extract_strided_slice %82 {offsets = [0, 16], sizes = [8, 8], strides = [1, 1]} : vector<8x32xf32> to vector<8x8xf32>
    %c0_65 = arith.constant 0 : index
    %c2 = arith.constant 2 : index
    %c0_66 = arith.constant 0 : index
    %c0_67 = arith.constant 0 : index
    %163 = vector.load %arg16[%c0_65, %c2, %c0_66, %c0_67] : memref<1x4x8x8xf32, #tpu.memory_space<vmem>>, vector<1x1x8x8xf32>
    %164 = vector.shape_cast %163 : vector<1x1x8x8xf32> to vector<8x8xf32>
    %165 = vector.shape_cast %162 : vector<8x8xf32> to vector<1x1x8x8xf32>
    tpu.vector_store %arg16[%c0_65, %c2, %c0_66, %c0_67], %165 {strides = array<i32>} : memref<1x4x8x8xf32, #tpu.memory_space<vmem>>, vector<1x1x8x8xf32>,
    %166 = vector.extract_strided_slice %40 {offsets = [0, 16], sizes = [8, 8], strides = [1, 1]} : vector<8x32xf32> to vector<8x8xf32>
    %c0_68 = arith.constant 0 : index
    %c2_69 = arith.constant 2 : index
    %c0_70 = arith.constant 0 : index
    %c0_71 = arith.constant 0 : index
    %167 = vector.load %arg17[%c0_68, %c2_69, %c0_70, %c0_71] : memref<1x4x8x8xf32, #tpu.memory_space<vmem>>, vector<1x1x8x8xf32>
    %168 = vector.shape_cast %167 : vector<1x1x8x8xf32> to vector<8x8xf32>
    %169 = vector.shape_cast %166 : vector<8x8xf32> to vector<1x1x8x8xf32>
    tpu.vector_store %arg17[%c0_68, %c2_69, %c0_70, %c0_71], %169 {strides = array<i32>} : memref<1x4x8x8xf32, #tpu.memory_space<vmem>>, vector<1x1x8x8xf32>,
    %170 = vector.extract_strided_slice %89 {offsets = [0, 24], sizes = [8, 8], strides = [1, 1]} : vector<8x32xbf16> to vector<8x8xbf16>
    %171 = vector.extract_strided_slice %90 {offsets = [0, 24], sizes = [8, 8], strides = [1, 1]} : vector<8x32xbf16> to vector<8x8xbf16>
    %cst_72 = arith.constant dense<0.000000e+00> : vector<8x8xf32>
    %172 = tpu.matmul %170, %171, %cst_72 {dimension_numbers = #tpu.dot_dimension_numbers<[1], [1], [0], [0], [0, 0, 1, 0], [], []>} : vector<8x8xbf16>, vector<8x8xbf16>, vector<8x8xf32> -> vector<8x8xf32>
    %173 = arith.addf %172, %88 : vector<8x8xf32>
    %cst_73 = arith.constant dense<0xFF800000> : vector<8xf32>
    %174 = vector.multi_reduction <maximumf>, %173, %cst_73 [1] : vector<8x8xf32> to vector<8xf32>
    %175 = vector.shape_cast %174 : vector<8xf32> to vector<8x1xf32>
    %176 = vector.broadcast %175 : vector<8x1xf32> to vector<8x8xf32>
    %177 = arith.subf %173, %176 : vector<8x8xf32>
    %178 = math.exp %177 : vector<8x8xf32>
    %cst_74 = arith.constant dense<0.000000e+00> : vector<8xf32>
    %179 = vector.multi_reduction <add>, %178, %cst_74 [1] : vector<8x8xf32> to vector<8xf32>
    %180 = vector.shape_cast %179 : vector<8xf32> to vector<8x1xf32>
    %181 = tpu.reciprocal %180 {approx = true} : vector<8x1xf32> -> vector<8x1xf32>
    %182 = vector.broadcast %181 : vector<8x1xf32> to vector<8x8xf32>
    %183 = arith.mulf %178, %182 : vector<8x8xf32>
    %184 = arith.truncf %183 : vector<8x8xf32> to vector<8x8xbf16>
    %185 = vector.extract_strided_slice %91 {offsets = [0, 24], sizes = [8, 8], strides = [1, 1]} : vector<8x32xbf16> to vector<8x8xbf16>
    %cst_75 = arith.constant dense<0.000000e+00> : vector<8x8xf32>
    %186 = tpu.matmul %184, %185, %cst_75 {dimension_numbers = #tpu.dot_dimension_numbers<[1], [0], [0], [1], [0, 0, 1, 1], [], []>} : vector<8x8xbf16>, vector<8x8xbf16>, vector<8x8xf32> -> vector<8x8xf32>
    %c0_76 = arith.constant 0 : index
    %c24 = arith.constant 24 : index
    %187 = vector.load %arg18[%c0_76, %c24] : memref<8x32xf32, #tpu.memory_space<vmem>>, vector<8x8xf32>
    tpu.vector_store %arg18[%c0_76, %c24], %186 {strides = array<i32>} : memref<8x32xf32, #tpu.memory_space<vmem>>, vector<8x8xf32>,
    %188 = vector.extract_strided_slice %82 {offsets = [0, 24], sizes = [8, 8], strides = [1, 1]} : vector<8x32xf32> to vector<8x8xf32>
    %c0_77 = arith.constant 0 : index
    %c3 = arith.constant 3 : index
    %c0_78 = arith.constant 0 : index
    %c0_79 = arith.constant 0 : index
    %189 = vector.load %arg16[%c0_77, %c3, %c0_78, %c0_79] : memref<1x4x8x8xf32, #tpu.memory_space<vmem>>, vector<1x1x8x8xf32>
    %190 = vector.shape_cast %189 : vector<1x1x8x8xf32> to vector<8x8xf32>
    %191 = vector.shape_cast %188 : vector<8x8xf32> to vector<1x1x8x8xf32>
    tpu.vector_store %arg16[%c0_77, %c3, %c0_78, %c0_79], %191 {strides = array<i32>} : memref<1x4x8x8xf32, #tpu.memory_space<vmem>>, vector<1x1x8x8xf32>,
    %192 = vector.extract_strided_slice %40 {offsets = [0, 24], sizes = [8, 8], strides = [1, 1]} : vector<8x32xf32> to vector<8x8xf32>
    %c0_80 = arith.constant 0 : index
    %c3_81 = arith.constant 3 : index
    %c0_82 = arith.constant 0 : index
    %c0_83 = arith.constant 0 : index
    %193 = vector.load %arg17[%c0_80, %c3_81, %c0_82, %c0_83] : memref<1x4x8x8xf32, #tpu.memory_space<vmem>>, vector<1x1x8x8xf32>
    %194 = vector.shape_cast %193 : vector<1x1x8x8xf32> to vector<8x8xf32>
    %195 = vector.shape_cast %192 : vector<8x8xf32> to vector<1x1x8x8xf32>
    tpu.vector_store %arg17[%c0_80, %c3_81, %c0_82, %c0_83], %195 {strides = array<i32>} : memref<1x4x8x8xf32, #tpu.memory_space<vmem>>, vector<1x1x8x8xf32>,
    %c0_84 = arith.constant 0 : index
    %c0_85 = arith.constant 0 : index
    %196 = vector.load %arg18[%c0_84, %c0_85] : memref<8x32xf32, #tpu.memory_space<vmem>>, vector<8x32xf32>
    %197 = arith.truncf %196 : vector<8x32xf32> to vector<8x32xbf16>
    %c0_86 = arith.constant 0 : index
    %c0_87 = arith.constant 0 : index
    %198 = vector.load %arg5[%c0_86, %c0_87] : memref<32x32xbf16, #tpu.memory_space<vmem>>, vector<32x32xbf16>
    %cst_88 = arith.constant dense<0.000000e+00> : vector<8x32xf32>
    %199 = tpu.matmul %197, %198, %cst_88 {dimension_numbers = #tpu.dot_dimension_numbers<[1], [1], [0], [0], [0, 0, 1, 0], [], []>} : vector<8x32xbf16>, vector<32x32xbf16>, vector<8x32xf32> -> vector<8x32xf32>
    %200 = arith.addf %1, %199 : vector<8x32xf32>
    %c0_89 = arith.constant 0 : index
    %c0_90 = arith.constant 0 : index
    %201 = vector.load %arg11[%c0_89, %c0_90] : memref<1x32xf32, #tpu.memory_space<vmem>>, vector<1x32xf32>
    %202 = vector.shape_cast %201 : vector<1x32xf32> to vector<32xf32>
    %c0_91 = arith.constant 0 : index
    %c0_92 = arith.constant 0 : index
    %203 = vector.load %arg12[%c0_91, %c0_92] : memref<1x32xf32, #tpu.memory_space<vmem>>, vector<1x32xf32>
    %204 = vector.shape_cast %203 : vector<1x32xf32> to vector<32xf32>
    %cst_93 = arith.constant dense<0.000000e+00> : vector<8xf32>
    %205 = vector.multi_reduction <add>, %200, %cst_93 [1] : vector<8x32xf32> to vector<8xf32>
    %206 = vector.shape_cast %205 : vector<8xf32> to vector<8x1xf32>
    %cst_94 = arith.constant 3.200000e+01 : f32
    %207 = vector.broadcast %cst_94 : f32 to vector<8x1xf32>
    %208 = arith.divf %206, %207 : vector<8x1xf32>
    %209 = vector.broadcast %208 : vector<8x1xf32> to vector<8x32xf32>
    %210 = arith.subf %200, %209 : vector<8x32xf32>
    %211 = arith.mulf %210, %210 : vector<8x32xf32>
    %cst_95 = arith.constant dense<0.000000e+00> : vector<8xf32>
    %212 = vector.multi_reduction <add>, %211, %cst_95 [1] : vector<8x32xf32> to vector<8xf32>
    %213 = vector.shape_cast %212 : vector<8xf32> to vector<8x1xf32>
    %cst_96 = arith.constant 3.200000e+01 : f32
    %214 = vector.broadcast %cst_96 : f32 to vector<8x1xf32>
    %215 = arith.divf %213, %214 : vector<8x1xf32>
    %216 = vector.broadcast %208 : vector<8x1xf32> to vector<8x32xf32>
    %217 = arith.subf %200, %216 : vector<8x32xf32>
    %cst_97 = arith.constant 9.99999997E-7 : f32
    %218 = vector.broadcast %cst_97 : f32 to vector<8x1xf32>
    %219 = arith.addf %215, %218 : vector<8x1xf32>
    %220 = math.rsqrt %219 : vector<8x1xf32>
    %221 = vector.broadcast %220 : vector<8x1xf32> to vector<8x32xf32>
    %222 = arith.mulf %217, %221 : vector<8x32xf32>
    %223 = vector.shape_cast %202 : vector<32xf32> to vector<1x32xf32>
    %224 = vector.broadcast %223 : vector<1x32xf32> to vector<8x32xf32>
    %225 = arith.mulf %222, %224 : vector<8x32xf32>
    %226 = vector.shape_cast %204 : vector<32xf32> to vector<1x32xf32>
    %227 = vector.broadcast %226 : vector<1x32xf32> to vector<8x32xf32>
    %228 = arith.addf %225, %227 : vector<8x32xf32>
    %229 = arith.truncf %228 : vector<8x32xf32> to vector<8x32xbf16>
    %c0_98 = arith.constant 0 : index
    %c0_99 = arith.constant 0 : index
    %230 = vector.load %arg6[%c0_98, %c0_99] : memref<64x32xbf16, #tpu.memory_space<vmem>>, vector<64x32xbf16>
    %cst_100 = arith.constant dense<0.000000e+00> : vector<8x64xf32>
    %231 = tpu.matmul %229, %230, %cst_100 {dimension_numbers = #tpu.dot_dimension_numbers<[1], [1], [0], [0], [0, 0, 1, 0], [], []>} : vector<8x32xbf16>, vector<64x32xbf16>, vector<8x64xf32> -> vector<8x64xf32>
    %232 = arith.truncf %228 : vector<8x32xf32> to vector<8x32xbf16>
    %c0_101 = arith.constant 0 : index
    %c0_102 = arith.constant 0 : index
    %233 = vector.load %arg7[%c0_101, %c0_102] : memref<64x32xbf16, #tpu.memory_space<vmem>>, vector<64x32xbf16>
    %cst_103 = arith.constant dense<0.000000e+00> : vector<8x64xf32>
    %234 = tpu.matmul %232, %233, %cst_103 {dimension_numbers = #tpu.dot_dimension_numbers<[1], [1], [0], [0], [0, 0, 1, 0], [], []>} : vector<8x32xbf16>, vector<64x32xbf16>, vector<8x64xf32> -> vector<8x64xf32>
    %235 = arith.negf %231 : vector<8x64xf32>
    %236 = math.exp %235 : vector<8x64xf32>
    %cst_104 = arith.constant 1.000000e+00 : f32
    %237 = vector.broadcast %cst_104 : f32 to vector<8x64xf32>
    %238 = arith.addf %237, %236 : vector<8x64xf32>
    %239 = arith.divf %237, %238 : vector<8x64xf32>
    %240 = arith.mulf %231, %239 : vector<8x64xf32>
    %cst_105 = arith.constant -1.000000e+01 : f32
    %cst_106 = arith.constant 1.000000e+01 : f32
    %241 = vector.broadcast %cst_105 : f32 to vector<8x64xf32>
    %242 = arith.maximumf %241, %240 : vector<8x64xf32>
    %243 = vector.broadcast %cst_106 : f32 to vector<8x64xf32>
    %244 = arith.minimumf %243, %242 : vector<8x64xf32>
    %cst_107 = arith.constant -1.000000e+01 : f32
    %cst_108 = arith.constant 1.000000e+01 : f32
    %245 = vector.broadcast %cst_107 : f32 to vector<8x64xf32>
    %246 = arith.maximumf %245, %234 : vector<8x64xf32>
    %247 = vector.broadcast %cst_108 : f32 to vector<8x64xf32>
    %248 = arith.minimumf %247, %246 : vector<8x64xf32>
    %249 = arith.mulf %244, %248 : vector<8x64xf32>
    %cst_109 = arith.constant -1.000000e+01 : f32
    %cst_110 = arith.constant 1.000000e+01 : f32
    %250 = vector.broadcast %cst_109 : f32 to vector<8x64xf32>
    %251 = arith.maximumf %250, %249 : vector<8x64xf32>
    %252 = vector.broadcast %cst_110 : f32 to vector<8x64xf32>
    %253 = arith.minimumf %252, %251 : vector<8x64xf32>
    %254 = arith.truncf %253 : vector<8x64xf32> to vector<8x64xbf16>
    %c0_111 = arith.constant 0 : index
    %c0_112 = arith.constant 0 : index
    %255 = vector.load %arg8[%c0_111, %c0_112] : memref<32x64xbf16, #tpu.memory_space<vmem>>, vector<32x64xbf16>
    %cst_113 = arith.constant dense<0.000000e+00> : vector<8x32xf32>
    %256 = tpu.matmul %254, %255, %cst_113 {dimension_numbers = #tpu.dot_dimension_numbers<[1], [1], [0], [0], [0, 0, 1, 0], [], []>} : vector<8x64xbf16>, vector<32x64xbf16>, vector<8x32xf32> -> vector<8x32xf32>
    %257 = arith.addf %200, %256 : vector<8x32xf32>
    %c0_114 = arith.constant 0 : index
    %c0_115 = arith.constant 0 : index
    %c0_116 = arith.constant 0 : index
    %258 = vector.load %arg15[%c0_114, %c0_115, %c0_116] : memref<1x8x32xf32, #tpu.memory_space<vmem>>, vector<1x8x32xf32>
    %259 = vector.shape_cast %258 : vector<1x8x32xf32> to vector<8x32xf32>
    %260 = vector.shape_cast %257 : vector<8x32xf32> to vector<1x8x32xf32>
    tpu.vector_store %arg15[%c0_114, %c0_115, %c0_116], %260 {strides = array<i32>} : memref<1x8x32xf32, #tpu.memory_space<vmem>>, vector<1x8x32xf32>,
    return
  }
  func.func @transform_0(%arg0: i32) -> (i32, i32, i32) {
    %c0_i32 = arith.constant 0 : i32
    %c0_i32_0 = arith.constant 0 : i32
    %c0_i32_1 = arith.constant 0 : i32
    return %arg0, %c0_i32, %c0_i32_0 : i32, i32, i32
  }
  func.func @transform_1(%arg0: i32) -> (i32, i32) {
    %c0_i32 = arith.constant 0 : i32
    %c0_i32_0 = arith.constant 0 : i32
    %c0_i32_1 = arith.constant 0 : i32
    return %c0_i32, %c0_i32_0 : i32, i32
  }
  func.func @transform_2(%arg0: i32) -> (i32, i32) {
    %c0_i32 = arith.constant 0 : i32
    %c0_i32_0 = arith.constant 0 : i32
    %c0_i32_1 = arith.constant 0 : i32
    return %c0_i32, %c0_i32_0 : i32, i32
  }
  func.func @transform_3(%arg0: i32) -> (i32, i32) {
    %c0_i32 = arith.constant 0 : i32
    %c0_i32_0 = arith.constant 0 : i32
    %c0_i32_1 = arith.constant 0 : i32
    return %c0_i32, %c0_i32_0 : i32, i32
  }
  func.func @transform_4(%arg0: i32) -> (i32, i32) {
    %c0_i32 = arith.constant 0 : i32
    %c0_i32_0 = arith.constant 0 : i32
    %c0_i32_1 = arith.constant 0 : i32
    return %c0_i32, %c0_i32_0 : i32, i32
  }
  func.func @transform_5(%arg0: i32) -> (i32, i32) {
    %c0_i32 = arith.constant 0 : i32
    %c0_i32_0 = arith.constant 0 : i32
    %c0_i32_1 = arith.constant 0 : i32
    return %c0_i32, %c0_i32_0 : i32, i32
  }
  func.func @transform_6(%arg0: i32) -> (i32, i32) {
    %c0_i32 = arith.constant 0 : i32
    %c0_i32_0 = arith.constant 0 : i32
    %c0_i32_1 = arith.constant 0 : i32
    return %c0_i32, %c0_i32_0 : i32, i32
  }
  func.func @transform_7(%arg0: i32) -> (i32, i32) {
    %c0_i32 = arith.constant 0 : i32
    %c0_i32_0 = arith.constant 0 : i32
    %c0_i32_1 = arith.constant 0 : i32
    return %c0_i32, %c0_i32_0 : i32, i32
  }
  func.func @transform_8(%arg0: i32) -> (i32, i32) {
    %c0_i32 = arith.constant 0 : i32
    %c0_i32_0 = arith.constant 0 : i32
    %c0_i32_1 = arith.constant 0 : i32
    return %c0_i32, %c0_i32_0 : i32, i32
  }
  func.func @transform_9(%arg0: i32) -> (i32, i32) {
    %c0_i32 = arith.constant 0 : i32
    %c0_i32_0 = arith.constant 0 : i32
    %c0_i32_1 = arith.constant 0 : i32
    return %c0_i32, %c0_i32_0 : i32, i32
  }
  func.func @transform_10(%arg0: i32) -> (i32, i32) {
    %c0_i32 = arith.constant 0 : i32
    %c0_i32_0 = arith.constant 0 : i32
    %c0_i32_1 = arith.constant 0 : i32
    return %c0_i32, %c0_i32_0 : i32, i32
  }
  func.func @transform_11(%arg0: i32) -> (i32, i32) {
    %c0_i32 = arith.constant 0 : i32
    %c0_i32_0 = arith.constant 0 : i32
    %c0_i32_1 = arith.constant 0 : i32
    return %c0_i32, %c0_i32_0 : i32, i32
  }
  func.func @transform_12(%arg0: i32) -> (i32, i32) {
    %c0_i32 = arith.constant 0 : i32
    %c0_i32_0 = arith.constant 0 : i32
    %c0_i32_1 = arith.constant 0 : i32
    return %c0_i32, %c0_i32_0 : i32, i32
  }
  func.func @transform_13(%arg0: i32) -> (i32, i32) {
    %c0_i32 = arith.constant 0 : i32
    %c0_i32_0 = arith.constant 0 : i32
    %c0_i32_1 = arith.constant 0 : i32
    return %c0_i32, %c0_i32_0 : i32, i32
  }
  func.func @transform_14(%arg0: i32) -> (i32, i32, i32) {
    %c0_i32 = arith.constant 0 : i32
    %c0_i32_0 = arith.constant 0 : i32
    %c0_i32_1 = arith.constant 0 : i32
    return %arg0, %c0_i32, %c0_i32_0 : i32, i32, i32
  }
  func.func @transform_15(%arg0: i32) -> (i32, i32, i32, i32) {
    %c0_i32 = arith.constant 0 : i32
    %c0_i32_0 = arith.constant 0 : i32
    %c0_i32_1 = arith.constant 0 : i32
    %c0_i32_2 = arith.constant 0 : i32
    return %arg0, %c0_i32, %c0_i32_0, %c0_i32_1 : i32, i32, i32, i32
  }
  func.func @transform_16(%arg0: i32) -> (i32, i32, i32, i32) {
    %c0_i32 = arith.constant 0 : i32
    %c0_i32_0 = arith.constant 0 : i32
    %c0_i32_1 = arith.constant 0 : i32
    %c0_i32_2 = arith.constant 0 : i32
    return %arg0, %c0_i32, %c0_i32_0, %c0_i32_1 : i32, i32, i32, i32
  }
}

</mosaic_0001>

<bundles_post_ra>
// kernel: tpu_custom_call.1
= control target key start
LH: loop header
LB: loop body
LE: loop exit
PB: predicated region body
PF: predicated region fallthrough
CT: control target
= control target key end

     0   :  { %s2923_s0 = inlined_call_operand.vmem [shape: f32[2,8,32], index: 0, kind: input, shape index: {}]   ;;  %s2924_s1 = inlined_call_operand.vmem [shape: bf16[32,32], index: 1, kind: input, shape index: {}]   ;;  %s2925_s2 = inlined_call_operand.vmem [shape: bf16[32,32], index: 2, kind: input, shape index: {}]   ;;  %s2926_s3 = inlined_call_operand.vmem [shape: bf16[32,32], index: 3, kind: input, shape index: {}]   ;;  %s2927_s4 = inlined_call_operand.vmem [shape: bf16[32,32], index: 4, kind: input, shape index: {}]   ;;  %s2928_s5 = inlined_call_operand.vmem [shape: bf16[64,32], index: 5, kind: input, shape index: {}]   ;;  %s2929_s6 = inlined_call_operand.vmem [shape: bf16[64,32], index: 6, kind: input, shape index: {}]   ;;  %s2930_s7 = inlined_call_operand.hbm [shape: bf16[32,64], index: 7, kind: input, shape index: {}]   ;;  %s2931_s8 = inlined_call_operand.vmem [shape: f32[1,32], index: 8, kind: input, shape index: {}]   ;;  %s2932_s9 = inlined_call_operand.vmem [shape: f32[1,32], index: 9, kind: input, shape index: {}]   ;;  %s2933_s10 = inlined_call_operand.vmem [shape: f32[1,32], index: 10, kind: input, shape index: {}]   ;;  %s2934_s11 = inlined_call_operand.vmem [shape: f32[1,32], index: 11, kind: input, shape index: {}]   ;;  %s2935_s12 = inlined_call_operand.vmem [shape: f32[8,32], index: 12, kind: input, shape index: {}]   ;;  %s2936_s13 = inlined_call_operand.vmem [shape: f32[8,32], index: 13, kind: input, shape index: {}]   ;;  %s2937_s14 = inlined_call_operand.hbm [shape: f32[2,8,32], index: 14, kind: output, shape index: {0}]   ;;  %s2938_s15 = inlined_call_operand.hbm [shape: f32[2,4,8,8], index: 15, kind: output, shape index: {1}]   ;;  %s2939_s16 = inlined_call_operand.hbm [shape: f32[2,4,8,8], index: 16, kind: output, shape index: {2}]  }
   0x1   :  { %2954 = sst [smem:[#allocation19_spill]] %s2923_s0 }
   0x2   :  { %2955 = sst [smem:[#allocation20_spill]] %s2924_s1 }
   0x3   :  { %2956 = sst [smem:[#allocation21_spill]] %s2925_s2 }
   0x4   :  { %2957 = sst [smem:[#allocation22_spill]] %s2926_s3 }
   0x5   :  { %22 = vsyncpa [#allocation4], 0 }
   0x6   :  { %23 = vsyncpa [#allocation5], 0 }
   0x7   :  { %25 = vsyncpa [#allocation5 + $0x1], 0 }
   0x8   :  { %26 = vsyncpa [#allocation8], 0 }
   0x9   :  { %28 = vsyncpa [#allocation8 + $0x1], 0  ;;  %s2440_s21 = smov 0   ;;  %s2442_s22 = smov 0  }
   0xa   :  { %s2444_s23 = smov 0   ;;  %s2446_s24 = smov 0  }
   0xb LB: > { %2958 = sst [smem:[#allocation13_spill]] %s2323_s21  ;;  %s2461_s25 = sadd.s32 4294967295, %s2335_s24   ;;  %s2335_s24 = sphi %s2446_s24, %s2984_s24   ;;  %s2331_s23 = sphi %s2444_s23, %s2986_s23   ;;  %s2327_s22 = sphi %s2442_s22, %s2988_s22   ;;  %s2323_s21 = sphi %s2440_s21, %s2987_s21  }
   0xc   : > { %2959 = sst [smem:[#allocation14_spill]] %s2331_s23  ;;  %s2940_s26 = sadd.s32 4294967294, %s2335_s24  }
   0xd   : > { %2960 = sst [smem:[#allocation15_spill]] %s2335_s24  ;;  %s2465_s27 = sadd.s32 1, %s2335_s24  }
   0xe   : > { %2961 = sst [smem:[#allocation16_spill]] %s2465_s27  ;;  %s340_s28 = sadd.s32 1, %s2331_s23 }
   0xf   : > { %s337_s29 = ssub.s32 %s2335_s24, %s2465_s27  ;;  %p350_p0 = scmp.ne.s32.totalorder %s2331_s23, %s2327_s22 }
  0x10   : > { %p338_p1 = scmp.eq.s32.totalorder %s337_s29, 0  ;;  %p351_p2 = scmp.eq.s32.totalorder %s2461_s25, 1 }
  0x11   : > { %p356_p3 = scmp.ne.s32.totalorder %s2327_s22, %s2323_s21  ;;  %p357_p4 = scmp.eq.s32.totalorder %s2940_s26, 1 }
  0x12   : > { %s2478_s30 = scalar_select %p338_p1, %s2331_s23, %s340_s28  }
  0x13   : > { %p2480_p5 = por %p351_p2, %p350_p0  ;;  %p2484_p6 = por %p357_p4, %p356_p3 }
  0x14   : > { %2962 = sst [smem:[#allocation17_spill]] %s2478_s30  ;;  %p1844_p7 = scmp.ge.s32.totalorder %s2335_s24, 1 }
  0x15   : > { %s2963_s0 = scalar_select %p2480_p5, 1, 0 }
  0x16   : > { %s2964_s17 = scalar_select %p2484_p6, 1, 0 }
  0x17   : > { %p416_p8 = scmp.lt.s32.totalorder %s2335_s24, 3  ;;  %p2946_p9 = scmp.eq.s32.totalorder %s2461_s25, 0 }
  0x18   : > { %2965 = sst [smem:[#allocation18_spill]] %s2964_s17  ;;  %s2337_s19 = smov [#allocation3]  }
  0x19   : > { %p2491_p10 = pnand %p1844_p7, %p416_p8  ;;  %s446_s20 = sshll.u32 %s2337_s19, 4  ;;  %s447_s20 = int_to_ptr.vmem [resolvable:$true] %s446_s20 }
  0x1a   : > { %s2181_s30 = scalar_lea.hbm %s2930_s7, 256 }
  0x1b   : > { %s2966_s18 = scalar_select %p2491_p10, 1, 0 }
  0x1c   : > { %p2075_p11 = pneg %p2491_p10  ;;  %p2182_p13 = scmp.ne.s32.totalorder %s2930_s7, %s2181_s30 }
  0x1d   : > { %p2188_p3 = scmp.lt.u32.totalorder %s2181_s30, %s2930_s7 }
  0x1e   : > { %p2499_p12 = pnand %p2946_p9, %p2075_p11 }
  0x20   : > { %p2183_p0 = pneg %p2499_p12 }
  0x22   : > { %p2184_p1 = pnand %p2183_p0, %p2182_p13 }
  0x24   : > { %p2185_p2 = pneg %p2184_p1 }
  0x26   : > { %p2190_p4 = pnand %p2188_p3, %p2185_p2 }
  0x28   : > { %2193 = shalt.err (!%p2190_p4)
}
  0x29   : > { %s2194_s21 = scalar_lea.vmem %s447_s20, 256  ;;  %p2202_p9 = scmp.lt.s32.totalorder %s447_s20, %s447_s20 }
  0x2a   : > { %p2195_p7 = scmp.ne.s32.totalorder %s447_s20, %s2194_s21  ;;  %p2203_p6 = scmp.lt.s32.totalorder %s2194_s21, %s2194_s21 }
  0x2c   : > { %p2197_p8 = pnand %p2195_p7, %p2183_p0  ;;  %p2204_p5 = por %p2203_p6, %p2202_p9 }
  0x2e   : > { %p2198_p11 = pneg %p2197_p8 }
  0x30   : > { %p2205_p10 = pnand %p2204_p5, %p2198_p11 }
  0x32   : > { %2208 = shalt.err (!%p2205_p10)
}
  0x33   : > { %s2338_s23 = smov 64   ;;  %s2339_s26 = smov 4  }
  0x34   : > { %2078 = dma.hbm_to_vmem [thread:$0]  (!%p2499_p12), %s2930_s7, 256, %s447_s20, [#allocation4], %s2338_s23, %s2338_s23, %s2339_s26  }
  0x35   : > { %p2968_p13 = scmp.ne.s32.totalorder %s2966_s18, 0 }
  0x36   : > { %p2969_p1 = scmp.eq.s32.totalorder (!%p2968_p13), %s2461_s25, 0 }
  0x37   : > { %487 = sbr.rel (%p2968_p13) target bundleno = 2780 (0xadc), region = 76 }
  0x3e   : > { %2310 = dma.done.wait (%p2969_p1), [#allocation4], 256   ;;  %p2970_p0 = pmov %p2969_p1 }
  0x3f   : > { %p546_p5 = scmp.lt.s32.totalorder %s2461_s25, 1  ;;  %s2971_s19 = sld [smem:[#allocation19_spill]]  ;;  %vm554_vm0 = vcmask 261120   ;;  %v2340_v9 = vmov 0.0   ;;  %vm2341_vm1 = vmmov 0   ;;  %vm782_vm2 = vcmask 64512  }
  0x40   : > { %2312 = vsyncadd (%p2970_p0), [#allocation4], 4294967040  ;;  %s2972_s1 = sld [smem:[#allocation20_spill]]  ;;  %s2973_s2 = sld [smem:[#allocation21_spill]]  ;;  %1953 = vmatprep.subr.bf16.mxu0 %v2340_v9  ;;  %1961 = vmatprep.subr.bf16.mxu1 %v2340_v9  ;;  %v1853_v20 = vld [vmem:[%s2931_s8] ss:$0 sm:$0xff] }
  0x41   : > { %s547_s21 = scalar_select %p546_p5, %s2461_s25, 1  ;;  %1957 = vmatprep.mubr.msk.bf16.mxu0 %vm2341_vm1, %v2340_v9  ;;  %1965 = vmatprep.mubr.msk.bf16.mxu1 %vm2341_vm1, %v2340_v9  ;;  %v1854_v22 = vld [vmem:[%s2932_s9] ss:$0 sm:$0xff]  ;;  %vm780_vm3 = vcmask 31744   ;;  %vm784_vm4 = vcmask 97280   ;;  %vm786_vm5 = vcmask 130048  }
  0x42   : > { %s2974_s3 = sld [smem:[#allocation22_spill]]  ;;  %s2343_s27 = smov 4   ;;  %vm788_vm6 = vcmask 162816   ;;  %vm790_vm7 = vcmask 195584   ;;  %vm792_vm8 = vcmask 228352   ;;  %v768_v53 = vld [vmem:[%s2935_s12] sm:$0xff] }
  0x43   : > { %s1852_s30 = sshll.u32 %s547_s21, 3  ;;  %s2588_s29 = sand.u32 1, %s2327_s22   ;;  %v769_v54 = vld [vmem:[%s2936_s13] sm:$0xff]  ;;  %vm885_vm9 = vcmask 1043456   ;;  %vm1049_vm11 = vcmask 130112   ;;  %vm1177_vm12 = vcmask 195712  }
  0x44   : > { %s1850_s21 = sshll.u32 %s2588_s29, 5  ;;  %s2344_s23 = smov 120   ;;  %vm1303_vm13 = vcmask 261312   ;;  %vm1603_vm14 = vcmask 523264  }
  0x45   : > { %s549_s24 = scalar_lea.vmem %s2971_s19, %s1852_s30  ;;  %s2595_s30 = scalar_lea.vmem [#allocation9], %s1850_s21 }
  0x46   : > { %v2530_v0 = vld [vmem:[%s549_s24] sm:$0xff]  ;;  %v2141_v12 = vld [vmem:[%s2972_s1 + $0x8] sm:$0xff]   ;;  %s2342_s24 = smov 124   ;;  %s2626_s20 = scalar_lea.vmem [#allocation7], %s1850_s21 }
  0x47   : > { %v555_v1 = vsel %vm554_vm0, %v2530_v0, 0.0  ;;  %v2139_v7 = vld [vmem:[%s2972_s1] sm:$0xff]   ;;  %v2142_v13 = vld [vmem:[%s2973_s2 + $0x8] sm:$0xff]   ;;  %v605_v14 = vsel %vm554_vm0, %v2141_v12, 0  ;;  %s2345_s26 = smov 112   ;;  %s2951_s17 = smov 8  }
  0x48   : > { %556 = vadd.xlane.f32.xlu0 %v555_v1  ;;  %v2140_v8 = vld [vmem:[%s2973_s2] sm:$0xff]   ;;  %v602_v10 = vsel %vm554_vm0, %v2139_v7, 0  ;;  %v666_v15 = vsel %vm554_vm0, %v2142_v13, 0  ;;  %v2144_v28 = vld [vmem:[%s2974_s3 + $0x8] sm:$0xff]   ;;  %s2349_s28 = smov 16   ;;  %s1692_s21 = sshll.u32 %s2626_s20, 4  ;;  %s2797_s21 = int_to_ptr.vmem [resolvable:$true] %s1692_s21 }
  0x49   : > { %v663_v11 = vsel %vm554_vm0, %v2140_v8, 0  ;;  %1954 = vmatpush3.bf16.xpose.msra.mxu0 %v602_v10  ;;  %v2143_v24 = vld [vmem:[%s2974_s3] sm:$0xff]   ;;  %v726_v29 = vsel %vm554_vm0, %v2144_v28, 0  ;;  %p2975_p9 = scmp.ne.s32.totalorder %s2963_s0, 0 }
  0x4a   : > { %1962 = vmatpush3.bf16.xpose.msra.mxu1 %v663_v11  ;;  %1955 = vmatprep.subr.bf16.mxu0 %v2340_v9  ;;  %v723_v27 = vsel %vm554_vm0, %v2143_v24, 0 }
  0x4b   : > { %1963 = vmatprep.subr.bf16.mxu1 %v2340_v9 }
  0x51   : > { %1956 = vmatpush3.bf16.xpose.msra.mxu0 %v605_v14 }
  0x52   : > { %1964 = vmatpush3.bf16.xpose.msra.mxu1 %v666_v15  ;;  %1969 = vmatprep.subr.bf16.mxu0 %v2340_v9 }
  0x53   : > { %1977 = vmatprep.subr.bf16.mxu1 %v2340_v9 }
  0xd5   : > { %v557_v2 = vpop.xlane.xlu0 %556 }
  0xd6   : > { %v559_v3 = vmul.f32 0.03125, %v557_v2 }
  0xd8   : > { %v560_v4 = vsub.f32 %v2530_v0, %v559_v3 }
  0xda   : > { %v561_v5 = vmul.f32 %v560_v4, %v560_v4 }
  0xdc   : > { %v562_v6 = vsel %vm554_vm0, %v561_v5, 0.0 }
  0xdd   : > { %563 = vadd.xlane.f32.xlu0 %v562_v6 }
 0x16a   : > { %v564_v16 = vpop.xlane.xlu0 %563 }
 0x16b   : > { %v565_v17 = vmul.f32 0.03125, %v564_v16 }
 0x16d   : > { %v566_v18 = vadd.f32 1e-06, %v565_v17 }
 0x16f   : > { %2157 = vrsqrt.f32 %v566_v18 }
 0x179   : > { %v2158_v19 = vpop.eup %2157 }
 0x17a   : > { %v568_v21 = vmul.f32 %v2158_v19, %v560_v4 }
 0x17c   : > { %v575_v23 = vmul.f32 %v1853_v20, %v568_v21 }
 0x17e   : > { %v582_v25 = vadd.f32 %v1854_v22, %v575_v23  ;;  %v815_v23 = vlaneseq }
 0x180   : > { %v583_v26 = vpack.c.bf16 %v582_v25, %v582_v25  ;;  %v816_v24 = vshrl.u32 %v815_v23, 7  ;;  %v818_v25 = vand.u32 127, %v815_v23 }
 0x182   : > { %1958 = vmatmul.mubr.msk.bf16.vlgmr.msra.gmra.mrb[0].mxu0 %vm554_vm0, %v583_v26  ;;  %1966 = vmatmul.mubr.msk.bf16.vlgmr.msra.gmra.mrb[0].mxu1 %vm554_vm0, %v583_v26  ;;  %vm819_vm10 = vcmp.le.s32.totalorder %v818_v25, %v816_v24 }
 0x183   : > { %1970 = vmatpush3.bf16.xpose.msra.mxu0 %v723_v27  ;;  %1973 = vmatprep.mubr.msk.bf16.mxu0 %vm2341_vm1, %v2340_v9 }
 0x184   : > { %1971 = vmatprep.subr.bf16.mxu0 %v2340_v9  ;;  %1979 = vmatprep.mubr.msk.bf16.mxu1 %vm2341_vm1, %v2340_v9 }
 0x18b   : > { %1972 = vmatpush3.bf16.xpose.msra.mxu0 %v726_v29 }
 0x18c   : > { %1989 = vmatprep.subr.bf16.mxu0 %v2340_v9 }
 0x192   : > { %1974 = vmatmul.mubr.msk.bf16.vlgmr.msra.gmra.mrb[4].mxu0 %vm554_vm0, %v583_v26  ;;  %v2347_v26 = vmov -1e+30  }
 0x193   : > { %1991 = vmatprep.mubr.msk.bf16.mxu0 %vm2341_vm1, %v2340_v9  ;;  %v820_v27 = vsel %vm819_vm10, 0.0, %v2347_v26 }
 0x255   : > { %v641_v30 = vpop.f32.mrb[0].mxu0  ;;  %v702_v31 = vpop.f32.mrb[0].mxu1 }
 0x256   : > { %v647_v32 = vmul.f32 0.35355338, %v641_v30  ;;  %v1959_v33 = vpop.f32.mrb[1].mxu0  ;;  %v1967_v34 = vpop.f32.mrb[1].mxu1  ;;  %v796_v35 = vsub.f32 0.0, %v702_v31  ;;  %v797_v61 = vmul.f32 %v768_v53, %v702_v31 }
 0x257   : > { %v644_v36 = vpop.f32.mrb[2].mxu0  ;;  %v705_v37 = vpop.f32.mrb[2].mxu1 }
 0x258   : > { %799 = vrot.lane.b32.xlu1 %v796_v35, %s2342_s24  ;;  %v1960_v38 = vpop.f32.mrb[3].mxu0  ;;  %v1968_v39 = vpop.f32.mrb[3].mxu1  ;;  %v770_v40 = vsub.f32 0.0, %v647_v32  ;;  %v771_v5 = vmul.f32 %v768_v53, %v647_v32 }
 0x25a   : > { %773 = vrot.lane.b32.xlu0 %v770_v40, %s2342_s24  ;;  %s2346_s24 = smov 104  }
 0x25c   : > { %803 = vrot.lane.b32.xlu1 %v702_v31, %s2343_s27 }
 0x260   : > { %777 = vrot.lane.b32.xlu1 %v647_v32, %s2343_s27  ;;  %s2350_s27 = smov 24  }
 0x265   : > { %v2591_v41 = vpop.f32.mrb[4].mxu0 }
 0x266   : > { %931 = vst.msk [vmem:[%s2595_s30] sm:$0xff] %vm782_vm2, %v2591_v41  ;;  %v1975_v42 = vpop.f32.mrb[5].mxu0  ;;  %v2636_v12 = vpack.c.bf16 %v2591_v41, %v2591_v41 }
 0x267   : > { %v765_v43 = vpop.f32.mrb[6].mxu0 }
 0x268   : > { %v1976_v44 = vpop.f32.mrb[7].mxu0  ;;  %v887_v13 = vsel %vm885_vm9, %v2636_v12, 0 }
 0x2ca   : > { %v800_v45 = vpop.permute.xlu1 %799 }
 0x2cc   : > { %v774_v50 = vpop.permute.xlu0 %773 }
 0x2ce   : > { %v804_v46 = vpop.permute.xlu1 %803 }
 0x2cf   : > { %v806_v47 = vsel %vm780_vm3, %v800_v45, %v804_v46 }
 0x2d0   : > { %v807_v48 = vsel %vm782_vm2, %v806_v47, %v800_v45 }
 0x2d1   : > { %v808_v49 = vsel %vm784_vm4, %v807_v48, %v804_v46 }
 0x2d2   : > { %v809_v51 = vsel %vm786_vm5, %v808_v49, %v800_v45  ;;  %v778_v52 = vpop.permute.xlu1 %777 }
 0x2d3   : > { %v810_v55 = vsel %vm788_vm6, %v809_v51, %v804_v46  ;;  %v781_v56 = vsel %vm780_vm3, %v774_v50, %v778_v52 }
 0x2d4   : > { %v811_v57 = vsel %vm790_vm7, %v810_v55, %v800_v45  ;;  %v783_v58 = vsel %vm782_vm2, %v781_v56, %v774_v50 }
 0x2d5   : > { %v812_v59 = vsel %vm792_vm8, %v811_v57, %v804_v46  ;;  %v785_v60 = vsel %vm784_vm4, %v783_v58, %v778_v52 }
 0x2d6   : > { %v813_v62 = vmul.f32 %v812_v59, %v769_v54  ;;  %v787_v63 = vsel %vm786_vm5, %v785_v60, %v774_v50 }
 0x2d7   : > { %v789_v1 = vsel %vm788_vm6, %v787_v63, %v778_v52 }
 0x2d8   : > { %v2618_v2 = vadd.f32 %v813_v62, %v797_v61  ;;  %v791_v3 = vsel %vm790_vm7, %v789_v1, %v774_v50 }
 0x2d9   : > { %v793_v4 = vsel %vm792_vm8, %v791_v3, %v778_v52 }
 0x2da   : > { %v794_v6 = vmul.f32 %v793_v4, %v769_v54  ;;  %v822_v7 = vpack.c.bf16 %v2618_v2, %v2618_v2  ;;  %930 = vst.msk [vmem:[%s2626_s20] sm:$0xff] %vm782_vm2, %v2618_v2 }
 0x2dc   : > { %936 = vrot.lane.b32.xlu1 %v822_v7, %s2344_s23  ;;  %v828_v8 = vsel %vm782_vm2, %v822_v7, 0  ;;  %v795_v10 = vadd.f32 %v794_v6, %v771_v5 }
 0x2dd   : > { %1978 = vmatpush3.bf16.xpose.msra.mxu1 %v828_v8 }
 0x2de   : > { %v821_v11 = vpack.c.bf16 %v795_v10, %v795_v10  ;;  %1983 = vmatprep.subr.bf16.mxu1 %v2340_v9 }
 0x2e0   : > { %1065 = vrot.lane.b32.xlu1 %v822_v7, %s2345_s26  ;;  %1189 = vrot.lane.b32.xlu0 %v821_v11, %s2346_s24 }
 0x2e4   : > { %933 = vrot.lane.b32.xlu1 %v821_v11, %s2344_s23  ;;  %1980 = vmatmul.mubr.msk.bf16.vlgmr.msra.gmra.mrb[4].mxu1 %vm782_vm2, %v821_v11 }
 0x2e5   : > { %1984 = vmatpush3.bf16.msra.mxu1 %v887_v13  ;;  %1985 = vmatprep.mubr.msk.bf16.mxu1 %vm2341_vm1, %v2340_v9 }
 0x2e6   : > { %1995 = vmatprep.subr.bf16.mxu1 %v2340_v9 }
 0x2e8   : > { %1063 = vrot.lane.b32.xlu1 %v821_v11, %s2345_s26 }
 0x2ec   : > { %1191 = vrot.lane.b32.xlu1 %v822_v7, %s2346_s24 }
 0x34e   : > { %v937_v14 = vpop.permute.xlu1 %936 }
 0x34f   : > { %v942_v15 = vsel %vm782_vm2, %v937_v14, 0 }
 0x350   : > { %1990 = vmatpush3.bf16.xpose.msra.mxu0 %v942_v15 }
 0x351   : > { %2001 = vmatprep.subr.bf16.mxu0 %v2340_v9 }
 0x352   : > { %v1066_v16 = vpop.permute.xlu1 %1065  ;;  %v1190_v22 = vpop.permute.xlu0 %1189 }
 0x353   : > { %v1071_v18 = vsel %vm782_vm2, %v1066_v16, 0 }
 0x356   : > { %v934_v17 = vpop.permute.xlu1 %933 }
 0x357   : > { %1992 = vmatmul.mubr.msk.bf16.vlgmr.msra.gmra.mrb[8].mxu0 %vm782_vm2, %v934_v17 }
 0x358   : > { %2002 = vmatpush3.bf16.xpose.msra.mxu0 %v1071_v18  ;;  %2003 = vmatprep.mubr.msk.bf16.mxu0 %vm2341_vm1, %v2340_v9 }
 0x359   : > { %2013 = vmatprep.subr.bf16.mxu0 %v2340_v9 }
 0x35a   : > { %v1064_v19 = vpop.permute.xlu1 %1063 }
 0x35e   : > { %v1192_v20 = vpop.permute.xlu1 %1191 }
 0x35f   : > { %v1197_v21 = vsel %vm782_vm2, %v1192_v20, 0  ;;  %2004 = vmatmul.mubr.msk.bf16.vlgmr.msra.gmra.mrb[12].mxu0 %vm782_vm2, %v1064_v19 }
 0x360   : > { %2014 = vmatpush3.bf16.xpose.msra.mxu0 %v1197_v21  ;;  %2015 = vmatprep.mubr.msk.bf16.mxu0 %vm2341_vm1, %v2340_v9 }
 0x361   : > { %2025 = vmatprep.subr.bf16.mxu0 %v2340_v9 }
 0x367   : > { %2016 = vmatmul.mubr.msk.bf16.vlgmr.msra.gmra.mrb[16].mxu0 %vm782_vm2, %v1190_v22 }
 0x368   : > { %2029 = vmatprep.mubr.msk.bf16.mxu0 %vm2341_vm1, %v2340_v9 }
 0x3b7   : > { %v864_v28 = vpop.f32.mrb[4].mxu1 }
 0x3b8   : > { %v865_v29 = vadd.f32 %v864_v28, %v820_v27  ;;  %v1981_v30 = vpop.f32.mrb[5].mxu1 }
 0x3b9   : > { %v867_v31 = vpop.f32.mrb[6].mxu1 }
 0x3ba   : > { %v1982_v32 = vpop.f32.mrb[7].mxu1  ;;  %v870_v33 = vsel %vm782_vm2, %v865_v29, -inf }
 0x3bb   : > { %871 = vmax.xlane.f32.xlu1 %v870_v33 }
 0x42a   : > { %v978_v34 = vpop.f32.mrb[8].mxu0 }
 0x42b   : > { %v979_v35 = vadd.f32 %v978_v34, %v820_v27  ;;  %v1993_v36 = vpop.f32.mrb[9].mxu0 }
 0x42c   : > { %v981_v37 = vpop.f32.mrb[10].mxu0 }
 0x42d   : > { %v1994_v38 = vpop.f32.mrb[11].mxu0  ;;  %v984_v39 = vsel %vm782_vm2, %v979_v35, -inf }
 0x42e   : > { %985 = vmax.xlane.f32.xlu0 %v984_v39  ;;  %v2145_v38 = vld [vmem:[%s2927_s4] sm:$0xff]  }
 0x42f   : > { %v1335_v39 = vsel %vm554_vm0, %v2145_v38, 0 }
 0x430   : > { %2026 = vmatpush3.bf16.xpose.msra.mxu0 %v1335_v39  ;;  %v2155_v39 = vld [vmem:[#allocation3] sm:$0xff]  }
 0x431   : > { %2027 = vmatprep.subr.bf16.mxu0 %v2340_v9 }
 0x432   : > { %v1107_v40 = vpop.f32.mrb[12].mxu0 }
 0x433   : > { %v1108_v42 = vadd.f32 %v1107_v40, %v820_v27  ;;  %v2005_v43 = vpop.f32.mrb[13].mxu0 }
 0x434   : > { %v1110_v44 = vpop.f32.mrb[14].mxu0 }
 0x435   : > { %v2006_v45 = vpop.f32.mrb[15].mxu0  ;;  %v1113_v46 = vsel %vm782_vm2, %v1108_v42, -inf }
 0x436   : > { %1114 = vmax.xlane.f32.xlu0 %v1113_v46 }
 0x43a   : > { %v1233_v47 = vpop.f32.mrb[16].mxu0 }
 0x43b   : > { %v1234_v48 = vadd.f32 %v1233_v47, %v820_v27  ;;  %v2017_v49 = vpop.f32.mrb[17].mxu0 }
 0x43c   : > { %v1236_v50 = vpop.f32.mrb[18].mxu0  ;;  %v2146_v49 = vld [vmem:[%s2927_s4 + $0x8] sm:$0xff]  }
 0x43d   : > { %v2018_v51 = vpop.f32.mrb[19].mxu0  ;;  %v1239_v52 = vsel %vm782_vm2, %v1234_v48, -inf  ;;  %v1338_v50 = vsel %vm554_vm0, %v2146_v49, 0 }
 0x43e   : > { %1240 = vmax.xlane.f32.xlu1 %v1239_v52  ;;  %2028 = vmatpush3.bf16.xpose.msra.mxu0 %v1338_v50 }
 0x43f   : > { %2045 = vmatprep.subr.bf16.mxu0 %v2340_v9 }
 0x448   : > { %v872_v53 = vpop.xlane.xlu1 %871 }
 0x449   : > { %v873_v54 = vsub.f32 %v865_v29, %v872_v53 }
 0x44b   : > { %v874_v55 = vmul.f32 1.442695, %v873_v54 }
 0x44d   : > { %2159 = vpow2.f32 %v874_v55 }
 0x457   : > { %v2160_v56 = vpop.eup %2159 }
 0x458   : > { %v876_v57 = vsel %vm782_vm2, %v2160_v56, 0.0 }
 0x459   : > { %877 = vadd.xlane.f32.xlu0 %v876_v57 }
 0x4bb   : > { %v986_v58 = vpop.xlane.xlu0 %985 }
 0x4bc   : > { %v987_v59 = vsub.f32 %v979_v35, %v986_v58 }
 0x4be   : > { %v988_v60 = vmul.f32 1.442695, %v987_v59 }
 0x4c0   : > { %2161 = vpow2.f32 %v988_v60 }
 0x4c3   : > { %v1115_v61 = vpop.xlane.xlu0 %1114 }
 0x4c4   : > { %v1116_v62 = vsub.f32 %v1108_v42, %v1115_v61 }
 0x4c6   : > { %v1117_v63 = vmul.f32 1.442695, %v1116_v62 }
 0x4c8   : > { %2163 = vpow2.f32 %v1117_v63 }
 0x4ca   : > { %v2162_v1 = vpop.eup %2161 }
 0x4cb   : > { %v990_v3 = vsel %vm782_vm2, %v2162_v1, 0.0  ;;  %v1241_v7 = vpop.xlane.xlu1 %1240 }
 0x4cc   : > { %991 = vadd.xlane.f32.xlu1 %v990_v3  ;;  %v1242_v8 = vsub.f32 %v1234_v48, %v1241_v7 }
 0x4ce   : > { %v1243_v10 = vmul.f32 1.442695, %v1242_v8 }
 0x4d2   : > { %v2164_v4 = vpop.eup %2163 }
 0x4d3   : > { %v1119_v5 = vsel %vm782_vm2, %v2164_v4, 0.0 }
 0x4d4   : > { %1120 = vadd.xlane.f32.xlu0 %v1119_v5 }
 0x4dd   : > { %1125 = vrot.lane.b32.xlu1 %v2636_v12, %s2345_s26 }
 0x4e6   : > { %v878_v6 = vpop.xlane.xlu0 %877 }
 0x4e7   : > { %2165 = vrcp.f32 %v878_v6 }
 0x4e8   : > { %2167 = vpow2.f32 %v1243_v10 }
 0x4ea   : > { %997 = vrot.lane.b32.xlu0 %v2636_v12, %s2344_s23 }
 0x4f1   : > { %v2166_v11 = vpop.eup %2165 }
 0x4f2   : > { %v880_v13 = vmul.f32 %v2166_v11, %v2160_v56  ;;  %v2168_v15 = vpop.eup %2167 }
 0x4f3   : > { %v1245_v16 = vsel %vm782_vm2, %v2168_v15, 0.0 }
 0x4f4   : > { %v881_v14 = vpack.c.bf16 %v880_v13, %v880_v13 }
 0x4f6   : > { %1986 = vmatmul.mubr.msk.bf16.vlgmr.msra.gmra.mrb[8].mxu1 %vm782_vm2, %v881_v14 }
 0x4f7   : > { %1997 = vmatprep.mubr.msk.bf16.mxu1 %vm2341_vm1, %v2340_v9 }
 0x501   : > { %1246 = vadd.xlane.f32.xlu1 %v1245_v16 }
 0x512   : > { %1251 = vrot.lane.b32.xlu1 %v2636_v12, %s2346_s24 }
 0x559   : > { %v992_v17 = vpop.xlane.xlu1 %991 }
 0x55a   : > { %2169 = vrcp.f32 %v992_v17  ;;  %v2149_v17 = vld [vmem:[%s2928_s5 + $0x8] sm:$0xff]  }
 0x55d   : > { %v1126_v23 = vpop.permute.xlu1 %1125 }
 0x55e   : > { %v1131_v25 = vsel %vm885_vm9, %v1126_v23, 0 }
 0x561   : > { %v1121_v18 = vpop.xlane.xlu0 %1120 }
 0x562   : > { %2171 = vrcp.f32 %v1121_v18  ;;  %v2150_v18 = vld [vmem:[%s2929_s6 + $0x8] sm:$0xff]  }
 0x564   : > { %v2170_v19 = vpop.eup %2169 }
 0x565   : > { %v994_v20 = vmul.f32 %v2170_v19, %v2162_v1  ;;  %v998_v21 = vpop.permute.xlu0 %997  ;;  %v1446_v19 = vsel %vm554_vm0, %v2149_v17, 0 }
 0x566   : > { %v1003_v22 = vsel %vm885_vm9, %v998_v21, 0  ;;  %v2151_v21 = vld [vmem:[%s2928_s5 + $0x10] sm:$0xff]  }
 0x567   : > { %1996 = vmatpush3.bf16.msra.mxu1 %v1003_v22  ;;  %v995_v24 = vpack.c.bf16 %v994_v20, %v994_v20  ;;  %v1526_v20 = vsel %vm554_vm0, %v2150_v18, 0  ;;  %v2152_v22 = vld [vmem:[%s2929_s6 + $0x10] sm:$0xff]   ;;  %v1449_v23 = vsel %vm554_vm0, %v2151_v21, 0 }
 0x568   : > { %2007 = vmatprep.subr.bf16.mxu1 %v2340_v9 }
 0x56a   : > { %1998 = vmatmul.mubr.msk.bf16.vlgmr.msra.gmra.mrb[12].mxu1 %vm782_vm2, %v995_v24  ;;  %v1529_v24 = vsel %vm554_vm0, %v2152_v22, 0 }
 0x56b   : > { %2008 = vmatpush3.bf16.msra.mxu1 %v1131_v25  ;;  %2009 = vmatprep.mubr.msk.bf16.mxu1 %vm2341_vm1, %v2340_v9  ;;  %v2153_v25 = vld [vmem:[%s2928_s5 + $0x18] sm:$0xff]  }
 0x56c   : > { %v2172_v12 = vpop.eup %2171  ;;  %2019 = vmatprep.subr.bf16.mxu1 %v2340_v9 }
 0x56d   : > { %v1123_v26 = vmul.f32 %v2172_v12, %v2164_v4  ;;  %v2148_v4 = vld [vmem:[%s2929_s6] sm:$0xff]   ;;  %v1452_v12 = vsel %vm554_vm0, %v2153_v25, 0 }
 0x56e   : > { %v1523_v6 = vsel %vm554_vm0, %v2148_v4, 0 }
 0x56f   : > { %v1124_v27 = vpack.c.bf16 %v1123_v26, %v1123_v26 }
 0x572   : > { %2010 = vmatmul.mubr.msk.bf16.vlgmr.msra.gmra.mrb[16].mxu1 %vm782_vm2, %v1124_v27 }
 0x573   : > { %2021 = vmatprep.mubr.msk.bf16.mxu1 %vm2341_vm1, %v2340_v9 }
 0x58e   : > { %v1247_v28 = vpop.xlane.xlu1 %1246 }
 0x58f   : > { %2173 = vrcp.f32 %v1247_v28 }
 0x592   : > { %v1252_v29 = vpop.permute.xlu1 %1251 }
 0x593   : > { %v1257_v30 = vsel %vm885_vm9, %v1252_v29, 0 }
 0x594   : > { %2020 = vmatpush3.bf16.msra.mxu1 %v1257_v30 }
 0x595   : > { %2033 = vmatprep.subr.bf16.mxu1 %v2340_v9 }
 0x599   : > { %v2174_v31 = vpop.eup %2173 }
 0x59a   : > { %v1249_v32 = vmul.f32 %v2174_v31, %v2168_v15 }
 0x59c   : > { %v1250_v33 = vpack.c.bf16 %v1249_v32, %v1249_v32 }
 0x59e   : > { %2022 = vmatmul.mubr.msk.bf16.vlgmr.msra.gmra.mrb[20].mxu1 %vm782_vm2, %v1250_v33  ;;  %v1881_v33 = vld [vmem:[%s2933_s10] ss:$0 sm:$0xff] }
 0x59f   : > { %2041 = vmatprep.mubr.msk.bf16.mxu1 %vm2341_vm1, %v2340_v9 }
 0x5c9   : > { %v923_v34 = vpop.f32.mrb[8].mxu1 }
 0x5ca   : > { %929 = vst.msk [vmem:[#allocation2] sm:$0xff] %vm782_vm2, %v923_v34  ;;  %v1987_v35 = vpop.f32.mrb[9].mxu1 }
 0x5cb   : > { %v926_v36 = vpop.f32.mrb[10].mxu1  ;;  %v1882_v35 = vld [vmem:[%s2934_s11] ss:$0 sm:$0xff] }
 0x5cc   : > { %v1988_v37 = vpop.f32.mrb[11].mxu1 }
 0x63d   : > { %v1039_v40 = vpop.f32.mrb[12].mxu1 }
 0x63e   : > { %1046 = vrot.lane.b32.xlu0 %v1039_v40, %s2951_s17  ;;  %v1999_v42 = vpop.f32.mrb[13].mxu1  ;;  %v1608_v40 = vsel %vm1603_vm14, %v2155_v39, 0 }
 0x63f   : > { %v1042_v43 = vpop.f32.mrb[14].mxu1  ;;  %v2156_v42 = vld [vmem:[#allocation3 + $0x8] sm:$0xff]  }
 0x640   : > { %v2000_v44 = vpop.f32.mrb[15].mxu1  ;;  %v1611_v43 = vsel %vm1603_vm14, %v2156_v42, 0 }
 0x645   : > { %v1167_v45 = vpop.f32.mrb[16].mxu1 }
 0x646   : > { %1174 = vrot.lane.b32.xlu1 %v1167_v45, %s2349_s28  ;;  %v2011_v46 = vpop.f32.mrb[17].mxu1  ;;  %s1660_s28 = sand.u32 1, %s2461_s25  }
 0x647   : > { %v1170_v47 = vpop.f32.mrb[18].mxu1  ;;  %s2808_s18 = scalar_lea.sflag [#allocation8], %s1660_s28 }
 0x648   : > { %v2012_v48 = vpop.f32.mrb[19].mxu1 }
 0x671   : > { %v1293_v51 = vpop.f32.mrb[20].mxu1 }
 0x672   : > { %1300 = vrot.lane.b32.xlu0 %v1293_v51, %s2350_s27  ;;  %v2023_v52 = vpop.f32.mrb[21].mxu1  ;;  %s2209_s27 = scalar_lea.vmem %s2797_s21, 512 }
 0x673   : > { %v1296_v53 = vpop.f32.mrb[22].mxu1  ;;  %p2210_p6 = scmp.ne.s32.totalorder %s2797_s21, %s2209_s27 }
 0x674   : > { %v2024_v54 = vpop.f32.mrb[23].mxu1 }
 0x675   : > { %p2211_p10 = pnand %p2210_p6, %p2975_p9 }
 0x677   : > { %p2212_p12 = pneg %p2211_p10 }
 0x6b0   : > { %v1047_v55 = vpop.permute.xlu0 %1046 }
 0x6b1   : > { %1050 = vst.msk [vmem:[#allocation2] sm:$0xff] %vm1049_vm11, %v1047_v55 }
 0x6b8   : > { %v1175_v56 = vpop.permute.xlu1 %1174 }
 0x6b9   : > { %1178 = vst.msk [vmem:[#allocation2] sm:$0xff] %vm1177_vm12, %v1175_v56 }
 0x6e4   : > { %v1301_v57 = vpop.permute.xlu0 %1300 }
 0x6e5   : > { %1304 = vst.msk [vmem:[#allocation2] sm:$0xff] %vm1303_vm13, %v1301_v57 }
 0x6ec   : > { %v1315_v58 = vld [vmem:[#allocation2] sm:$0xff] }
 0x6ed   : > { %v1316_v59 = vpack.c.bf16 %v1315_v58, %v1315_v58 }
 0x6ef   : > { %2030 = vmatmul.mubr.msk.bf16.vlgmr.msra.gmra.mrb[20].mxu0 %vm554_vm0, %v1316_v59 }
 0x6f0   : > { %2053 = vmatprep.mubr.msk.bf16.mxu0 %vm2341_vm1, %v2340_v9  ;;  %2046 = vmatpush3.bf16.xpose.msra.mxu0 %v1523_v6 }
 0x6f1   : > { %2047 = vmatprep.subr.bf16.mxu0 %v2340_v9 }
 0x6f8   : > { %2048 = vmatpush3.bf16.xpose.msra.mxu0 %v1526_v20 }
 0x6f9   : > { %2049 = vmatprep.subr.bf16.mxu0 %v2340_v9 }
 0x700   : > { %2050 = vmatpush3.bf16.xpose.msra.mxu0 %v1529_v24 }
 0x701   : > { %2051 = vmatprep.subr.bf16.mxu0 %v2340_v9 }
 0x7c2   : > { %v1374_v60 = vpop.f32.mrb[20].mxu0 }
 0x7c3   : > { %v2712_v61 = vadd.f32 %v1374_v60, %v2530_v0  ;;  %v2031_v62 = vpop.f32.mrb[21].mxu0  ;;  %v2147_v0 = vld [vmem:[%s2928_s5] sm:$0xff]  }
 0x7c4   : > { %v1377_v63 = vpop.f32.mrb[22].mxu0  ;;  %v1443_v5 = vsel %vm554_vm0, %v2147_v0, 0 }
 0x7c5   : > { %v2032_v1 = vpop.f32.mrb[23].mxu0  ;;  %v1383_v3 = vsel %vm554_vm0, %v2712_v61, 0.0  ;;  %2034 = vmatpush3.bf16.xpose.msra.mxu1 %v1443_v5 }
 0x7c6   : > { %1384 = vadd.xlane.f32.xlu1 %v1383_v3  ;;  %2035 = vmatprep.subr.bf16.mxu1 %v2340_v9 }
 0x7cd   : > { %2036 = vmatpush3.bf16.xpose.msra.mxu1 %v1446_v19 }
 0x7ce   : > { %2037 = vmatprep.subr.bf16.mxu1 %v2340_v9 }
 0x7d5   : > { %2038 = vmatpush3.bf16.xpose.msra.mxu1 %v1449_v23 }
 0x7d6   : > { %2039 = vmatprep.subr.bf16.mxu1 %v2340_v9 }
 0x7d7   : > { %1058 = vrot.lane.b32.xlu1 %v2591_v41, %s2344_s23 }
 0x7db   : > { %1179 = vrot.lane.b32.xlu1 %v2618_v2, %s2345_s26 }
 0x7dd   : > { %2040 = vmatpush3.bf16.xpose.msra.mxu1 %v1452_v12 }
 0x7de   : > { %2057 = vmatprep.subr.bf16.mxu1 %v2340_v9 }
 0x7df   : > { %1305 = vrot.lane.b32.xlu1 %v2618_v2, %s2346_s24 }
 0x853   : > { %v1385_v7 = vpop.xlane.xlu1 %1384 }
 0x854   : > { %v1386_v8 = vmul.f32 0.03125, %v1385_v7 }
 0x856   : > { %v1387_v10 = vsub.f32 %v2712_v61, %v1386_v8 }
 0x857   : > { %v1059_v11 = vpop.permute.xlu1 %1058 }
 0x858   : > { %1869 = vst.msk [vmem:[%s2595_s30 + $0x8] sm:$0xff] %vm782_vm2, %v1059_v11  ;;  %v1388_v13 = vmul.f32 %v1387_v10, %v1387_v10 }
 0x85a   : > { %v1389_v14 = vsel %vm554_vm0, %v1388_v13, 0.0 }
 0x85b   : > { %1390 = vadd.xlane.f32.xlu0 %v1389_v14  ;;  %v1180_v15 = vpop.permute.xlu1 %1179 }
 0x85c   : > { %1872 = vst.msk [vmem:[%s2626_s20 + $0x10] sm:$0xff] %vm782_vm2, %v1180_v15 }
 0x85f   : > { %v1306_v16 = vpop.permute.xlu1 %1305 }
 0x860   : > { %1876 = vst.msk [vmem:[%s2626_s20 + $0x18] sm:$0xff] %vm782_vm2, %v1306_v16 }
 0x871   : > { %1052 = vrot.lane.b32.xlu0 %v2618_v2, %s2344_s23  ;;  %v2154_v2 = vld [vmem:[%s2929_s6 + $0x18] sm:$0xff]   ;;  %s2953_s23 = sshll.u32 %s2461_s25, 9 }
 0x872   : > { %v1532_v26 = vsel %vm554_vm0, %v2154_v2, 0 }
 0x873   : > { %2052 = vmatpush3.bf16.xpose.msra.mxu0 %v1532_v26 }
 0x875   : > { %1184 = vrot.lane.b32.xlu0 %v2591_v41, %s2345_s26 }
 0x879   : > { %1310 = vrot.lane.b32.xlu0 %v2591_v41, %s2346_s24  ;;  %s2806_s24 = scalar_lea.hbm %s2938_s15, %s2953_s23 }
 0x8e8   : > { %v1391_v27 = vpop.xlane.xlu0 %1390 }
 0x8e9   : > { %v1392_v28 = vmul.f32 0.03125, %v1391_v27 }
 0x8eb   : > { %v1393_v29 = vadd.f32 1e-06, %v1392_v28 }
 0x8ec   : > { %v1053_v30 = vpop.permute.xlu0 %1052 }
 0x8ed   : > { %2175 = vrsqrt.f32 %v1393_v29  ;;  %1868 = vst.msk [vmem:[%s2626_s20 + $0x8] sm:$0xff] %vm782_vm2, %v1053_v30  ;;  %s2351_s20 = smov [#allocation7]  }
 0x8ee   : > { %s2213_s17 = sshll.u32 %s2351_s20, 4  ;;  %s2214_s17 = int_to_ptr.vmem [resolvable:$false] %s2213_s17 }
 0x8ef   : > { %s2215_s1 = scalar_lea.vmem %s2214_s17, 1024  ;;  %p2216_p2 = scmp.lt.s32.totalorder %s2797_s21, %s2214_s17 }
 0x8f0   : > { %v1185_v31 = vpop.permute.xlu0 %1184  ;;  %p2217_p3 = scmp.lt.s32.totalorder %s2215_s1, %s2209_s27 }
 0x8f1   : > { %1873 = vst.msk [vmem:[%s2595_s30 + $0x10] sm:$0xff] %vm782_vm2, %v1185_v31 }
 0x8f2   : > { %p2218_p4 = por %p2217_p3, %p2216_p2 }
 0x8f4   : > { %v1311_v32 = vpop.permute.xlu0 %1310  ;;  %p2219_p7 = pnand %p2218_p4, %p2212_p12 }
 0x8f5   : > { %1877 = vst.msk [vmem:[%s2595_s30 + $0x18] sm:$0xff] %vm782_vm2, %v1311_v32 }
 0x8f7   : > { %v2176_v41 = vpop.eup %2175 }
 0x8f8   : > { %v1395_v34 = vmul.f32 %v2176_v41, %v1387_v10 }
 0x8fa   : > { %v1402_v36 = vmul.f32 %v1881_v33, %v1395_v34 }
 0x8fc   : > { %v1409_v37 = vadd.f32 %v1882_v35, %v1402_v36 }
 0x8fe   : > { %v1410_v38 = vpack.c.bf16 %v1409_v37, %v1409_v37 }
 0x900   : > { %2042 = vmatmul.mubr.msk.bf16.vlgmr.msra.gmra.mrb[24].mxu1 %vm554_vm0, %v1410_v38  ;;  %2054 = vmatmul.mubr.msk.bf16.vlgmr.msra.gmra.mrb[24].mxu0 %vm554_vm0, %v1410_v38 }
 0x901   : > { %2061 = vmatprep.mubr.msk.bf16.mxu1 %vm2341_vm1, %v2340_v9  ;;  %2058 = vmatpush3.bf16.xpose.msra.mxu1 %v1608_v40 }
 0x902   : > { %2059 = vmatprep.subr.bf16.mxu1 %v2340_v9 }
 0x909   : > { %2060 = vmatpush3.bf16.xpose.msra.mxu1 %v1611_v43 }
 0x9d3   : > { %v1488_v44 = vpop.f32.mrb[24].mxu1  ;;  %v1568_v45 = vpop.f32.mrb[24].mxu0 }
 0x9d4   : > { %v1893_v46 = vmul.f32 -1.442695, %v1488_v44  ;;  %v2043_v47 = vpop.f32.mrb[25].mxu1  ;;  %v2055_v48 = vpop.f32.mrb[25].mxu0  ;;  %v1895_v57 = vclamps-f32 %v1568_v45, 10.0 }
 0x9d5   : > { %v1491_v49 = vpop.f32.mrb[26].mxu1  ;;  %v1571_v50 = vpop.f32.mrb[26].mxu0 }
 0x9d6   : > { %2177 = vpow2.f32 %v1893_v46  ;;  %v2044_v51 = vpop.f32.mrb[27].mxu1  ;;  %v2056_v52 = vpop.f32.mrb[27].mxu0 }
 0x9e0   : > { %v2178_v53 = vpop.eup %2177 }
 0x9e1   : > { %v1577_v9 = vadd.f32 1.0, %v2178_v53 }
 0x9e3   : > { %2179 = vrcp.f32 %v1577_v9 }
 0x9ed   : > { %v2180_v54 = vpop.eup %2179 }
 0x9ee   : > { %v1580_v55 = vmul.f32 %v2180_v54, %v1488_v44 }
 0x9f0   : > { %v1894_v56 = vclamps-f32 %v1580_v55, 10.0 }
 0x9f2   : > { %v1585_v58 = vmul.f32 %v1895_v57, %v1894_v56 }
 0x9f4   : > { %v1896_v59 = vclamps-f32 %v1585_v58, 10.0 }
 0x9f6   : > { %v1588_v60 = vpack.c.bf16 %v1896_v59, %v1896_v59 }
 0x9f8   : > { %2062 = vmatmul.mubr.msk.bf16.vlgmr.msra.gmra.mrb[28].mxu1 %vm1603_vm14, %v1588_v60 }
 0x9f9   : > { %2222 = shalt.err (!%p2219_p7)
}
 0x9fa   : > { %s2223_s28 = scalar_lea.hbm %s2806_s24, 512  ;;  %s2227_s20 = scalar_lea.hbm %s2938_s15, 1024 }
 0x9fb   : > { %p2224_p8 = scmp.ne.s32.totalorder %s2806_s24, %s2223_s28  ;;  %p2228_p1 = scmp.lt.u32.totalorder %s2806_s24, %s2938_s15 }
 0x9fc   : > { %p2229_p0 = scmp.lt.u32.totalorder %s2227_s20, %s2223_s28  ;;  %p2231_p6 = scmp.lt.u32.totalorder %s2223_s28, %s2806_s24 }
 0x9fd   : > { %p2225_p11 = pnand %p2224_p8, %p2975_p9 }
 0x9fe   : > { %p2230_p5 = por %p2229_p0, %p2228_p1 }
 0x9ff   : > { %p2226_p13 = pneg %p2225_p11 }
 0xa00   : > { %p2232_p10 = por %p2231_p6, %p2230_p5 }
 0xa02   : > { %p2233_p12 = pnand %p2232_p10, %p2226_p13 }
 0xa04   : > { %2236 = shalt.err (!%p2233_p12)
}
 0xa05   : > { %s2352_s1 = smov 128   ;;  %s2976_s27 = smov 8  }
 0xa06   : > { %2070 = dma.vmem_to_hbm [thread:$0]  (%p2975_p9), %s2797_s21, 512, %s2806_s24, %s2808_s18, %s2352_s1, %s2352_s1, %s2976_s27  }
 0xa07   : > { %s2977_s23 = sshll.u32 %s2595_s30, 4  ;;  %s2978_s28 = sshll.u32 %s2461_s25, 9  ;;  %s2837_s23 = int_to_ptr.vmem [resolvable:$true] %s2977_s23 }
 0xa08   : > { %s2844_s20 = scalar_lea.hbm %s2939_s16, %s2978_s28  ;;  %s2237_s17 = scalar_lea.vmem %s2837_s23, 512 }
 0xa09   : > { %p2238_p2 = scmp.ne.s32.totalorder %s2837_s23, %s2237_s17  ;;  %s2353_s2 = smov [#allocation9]  }
 0xa0a   : > { %s2241_s3 = sshll.u32 %s2353_s2, 4  ;;  %s2242_s3 = int_to_ptr.vmem [resolvable:$false] %s2241_s3 }
 0xa0b   : > { %p2239_p3 = pnand %p2238_p2, %p2975_p9  ;;  %s2243_s30 = scalar_lea.vmem %s2242_s3, 1024 }
 0xa0c   : > { %p2244_p7 = scmp.lt.s32.totalorder %s2837_s23, %s2242_s3  ;;  %p2245_p8 = scmp.lt.s32.totalorder %s2243_s30, %s2237_s17 }
 0xa0d   : > { %p2240_p4 = pneg %p2239_p3 }
 0xa0e   : > { %p2246_p11 = por %p2245_p8, %p2244_p7 }
 0xa10   : > { %p2247_p13 = pnand %p2246_p11, %p2240_p4 }
 0xa12   : > { %2250 = shalt.err (!%p2247_p13)
}
 0xa13   : > { %s2251_s21 = scalar_lea.hbm %s2844_s20, 512  ;;  %s2255_s2 = scalar_lea.hbm %s2939_s16, 1024 }
 0xa14   : > { %p2252_p1 = scmp.ne.s32.totalorder %s2844_s20, %s2251_s21  ;;  %p2256_p6 = scmp.lt.u32.totalorder %s2844_s20, %s2939_s16 }
 0xa15   : > { %p2257_p10 = scmp.lt.u32.totalorder %s2255_s2, %s2251_s21  ;;  %p2259_p2 = scmp.lt.u32.totalorder %s2251_s21, %s2844_s20 }
 0xa16   : > { %p2253_p0 = pnand %p2252_p1, %p2975_p9 }
 0xa17   : > { %p2258_p12 = por %p2257_p10, %p2256_p6 }
 0xa18   : > { %p2254_p5 = pneg %p2253_p0 }
 0xa19   : > { %p2260_p3 = por %p2259_p2, %p2258_p12 }
 0xa1b   : > { %p2261_p4 = pnand %p2260_p3, %p2254_p5 }
 0xa1d   : > { %2264 = shalt.err (!%p2261_p4)
}
 0xa1e   : > { %2071 = dma.vmem_to_hbm [thread:$0]  (%p2975_p9), %s2837_s23, 512, %s2844_s20, %s2808_s18, %s2352_s1, %s2352_s1, %s2976_s27  }
 0xa1f   : > { %s1849_s26 = sshll.u32 %s2588_s29, 3  ;;  %s1903_s17 = sshll.u32 %s2461_s25, 7 }
 0xa20   : > { %s531_s30 = scalar_lea.vmem [#allocation6], %s1849_s26  ;;  %s2877_s2 = scalar_lea.hbm %s2937_s14, %s1903_s17 }
 0xa21   : > { %s1679_s21 = sshll.u32 %s531_s30, 4  ;;  %s1656_s25 = scalar_lea.sflag [#allocation5], %s2588_s29  ;;  %s2879_s21 = int_to_ptr.vmem [resolvable:$true] %s1679_s21 }
 0xa22   : > { %s2265_s18 = scalar_lea.vmem %s2879_s21, 128  ;;  %s2354_s1 = smov [#allocation6]  }
 0xa23   : > { %p2266_p7 = scmp.ne.s32.totalorder %s2879_s21, %s2265_s18  ;;  %s2269_s27 = sshll.u32 %s2354_s1, 4  ;;  %s2270_s27 = int_to_ptr.vmem [resolvable:$false] %s2269_s27 }
 0xa24   : > { %s2271_s23 = scalar_lea.vmem %s2270_s27, 256  ;;  %p2272_p13 = scmp.lt.s32.totalorder %s2879_s21, %s2270_s27 }
 0xa25   : > { %p2267_p8 = pnand %p2266_p7, %p2975_p9  ;;  %p2273_p1 = scmp.lt.s32.totalorder %s2271_s23, %s2265_s18 }
 0xa27   : > { %p2268_p11 = pneg %p2267_p8  ;;  %p2274_p0 = por %p2273_p1, %p2272_p13 }
 0xa29   : > { %p2275_p5 = pnand %p2274_p0, %p2268_p11 }
 0xacb   : > { %v1647_v62 = vpop.f32.mrb[28].mxu1 }
 0xacc   : > { %v1653_v63 = vadd.f32 %v1647_v62, %v2712_v61  ;;  %v2063_v1 = vpop.f32.mrb[29].mxu1 }
 0xacd   : > { %v1650_v3 = vpop.f32.mrb[30].mxu1 }
 0xace   : > { %v2064_v0 = vpop.f32.mrb[31].mxu1  ;;  %1654 = vst.msk [vmem:[%s531_s30] sm:$0xff] %vm554_vm0, %v1653_v63 }
 0xacf   : > { %2278 = shalt.err (!%p2275_p5)
}
 0xad0   : > { %s2279_s29 = scalar_lea.hbm %s2877_s2, 128  ;;  %s2283_s3 = scalar_lea.hbm %s2937_s14, 256 }
 0xad1   : > { %p2280_p6 = scmp.ne.s32.totalorder %s2877_s2, %s2279_s29  ;;  %p2284_p2 = scmp.lt.u32.totalorder %s2877_s2, %s2937_s14 }
 0xad2   : > { %p2285_p3 = scmp.lt.u32.totalorder %s2283_s3, %s2279_s29  ;;  %p2287_p7 = scmp.lt.u32.totalorder %s2279_s29, %s2877_s2 }
 0xad3   : > { %p2281_p10 = pnand %p2280_p6, %p2975_p9 }
 0xad4   : > { %p2286_p4 = por %p2285_p3, %p2284_p2 }
 0xad5   : > { %p2282_p12 = pneg %p2281_p10 }
 0xad6   : > { %p2288_p8 = por %p2287_p7, %p2286_p4 }
 0xad8   : > { %p2289_p11 = pnand %p2288_p8, %p2282_p12 }
 0xada   : > { %2292 = shalt.err (!%p2289_p11)
}
 0xadb   : > { %2069 = dma.vmem_to_hbm [thread:$0]  (%p2975_p9), %s2879_s21, 128, %s2877_s2, %s1656_s25  }
 0xadc PF: > { %s2979_s30 = sld [smem:[#allocation15_spill]]  ;;  %s2980_s24 = sld [smem:[#allocation13_spill]] }
 0xadd   : > { %s2981_s28 = sld [smem:[#allocation18_spill]] }
 0xae2   : > { %p2091_p13 = scmp.ge.s32.totalorder %s2979_s30, 2  ;;  %s1723_s18 = sand.u32 1, %s2980_s24  }
 0xae3   : > { %p2982_p1 = scmp.ne.s32.totalorder %s2981_s28, 0  ;;  %s1724_s1 = scalar_lea.sflag [#allocation5], %s1723_s18 }
 0xae5   : > { %p2080_p0 = pnand %p2091_p13, %p2982_p1 }
 0xae7   : > { %2314 = dma.done.wait (!%p2080_p0), %s1724_s1, 128  }
 0xae8   : > { %2316 = vsyncadd (!%p2080_p0), %s1724_s1, 4294967168  ;;  %s2983_s27 = sadd.s32 4294967294, %s2979_s30  }
 0xae9   : > { %s1732_s23 = sand.u32 1, %s2983_s27  }
 0xaea   : > { %s1733_s29 = scalar_lea.sflag [#allocation8], %s1732_s23 }
 0xaeb   : > { %2318 = dma.done.wait (!%p2080_p0), %s1733_s29, 1024  }
 0xaec   : > { %2320 = vsyncadd (!%p2080_p0), %s1733_s29, 4294966272  ;;  %s2984_s24 = sld [smem:[#allocation16_spill]]  ;;  %s2985_s0 = sld [smem:[#allocation14_spill]] }
 0xaed   : > { %s2986_s23 = sld [smem:[#allocation17_spill]]  ;;  %s2987_s21 = smov %s2327_s22 }
 0xaf2   : > { %p31_p9 = scmp.ge.s32.totalorder %s2984_s24, 4   ;;  %s2988_s22 = smov %s2985_s0 }
 0xaf4   :  { %33 = sbr.rel (!%p31_p9) target bundleno = 11 (0xb), region = 154 }
 0xafb   :  { %1747 = vsyncpa [#allocation4], 1 }
 0xafc   :  { %1749 = vsyncpa [#allocation4 + $0x1], 1 }
 0xafd   :  { %1750 = vsyncpa [#allocation5], 1 }
 0xafe   :  { %1752 = vsyncpa [#allocation5 + $0x1], 1 }
 0xaff   :  { %1753 = vsyncpa [#allocation8], 1 }
 0xb00   :  { %1755 = vsyncpa [#allocation8 + $0x1], 1 }

</bundles_post_ra>
